<compile_context>
chip_gen: v7x
topology: tpu7x:2x2x1
jax: 0.10.0
libtpu: 0.0.40
codegen_flags: <defaults>
</compile_context>

<pallas_src>
import jax
import jax.numpy as jnp
import numpy as np
from jax.experimental import pallas as pl
from jax.experimental.pallas import tpu as pltpu

IGNORE_INDEX = -100


# ----------------------------------------------------------------------------
# TaggerLoss kernel: masked cross-entropy, mean over tokens with label != -100
# ----------------------------------------------------------------------------
def tagger_loss_kernel(logits_ref, labels_ref, total_ref, count_ref):
    """Per-tile masked cross-entropy accumulation (lane-dense layout).

    logits_ref: (C, TILE_N)  logits tile, classes on sublanes, tokens on lanes.
    labels_ref: (1, TILE_N)  int32 labels (IGNORE_INDEX marks ignored/padding).
    total_ref:  (1, 1) f32   running sum of per-token NLL (resident accumulator).
    count_ref:  (1, 1) f32   running count of valid tokens.
    """
    @pl.when(pl.program_id(0) == 0)
    def _init():
        total_ref[...] = jnp.zeros_like(total_ref)
        count_ref[...] = jnp.zeros_like(count_ref)

    logits = logits_ref[...].astype(jnp.float32)          # cast in-kernel (bf16 ok)
    labels = labels_ref[...]                              # (1, TILE_N)
    valid = labels != IGNORE_INDEX                        # (1, TILE_N)

    # Numerically stable log-sum-exp over the class (sublane) axis — every
    # exp/log/compare is full lane width.
    m = jnp.max(logits, axis=0, keepdims=True)            # (1, TILE_N)
    lse = m + jnp.log(jnp.sum(jnp.exp(logits - m), axis=0, keepdims=True))

    # Target-class logit via one-hot compare (no gather).  Out-of-range labels
    # would silently pick 0.0 (torch raises); labels are assumed in [0, C).
    cls = jax.lax.broadcasted_iota(jnp.int32, logits.shape, 0)   # (C, TILE_N)
    safe_labels = jnp.where(valid, labels, 0)              # (1, TILE_N)
    picked = jnp.sum(jnp.where(cls == safe_labels, logits, 0.0),
                     axis=0, keepdims=True)                # (1, TILE_N)

    # TODO(synk): torch's boolean-mask gather (outputs[mask]) has a
    # data-dependent shape; replaced by masked NLL sum + valid count, which is
    # mathematically identical for mean cross-entropy over the kept tokens.
    nll = jnp.where(valid, lse - picked, 0.0)               # (1, TILE_N)
    total_ref[...] += jnp.sum(nll, axis=1, keepdims=True)
    count_ref[...] += jnp.sum(valid.astype(jnp.float32), axis=1, keepdims=True)


def tagger_loss(outputs, labels, *, tile_n=512):
    """Pallas TaggerLoss.forward(outputs, labels) -> scalar mean CE.

    outputs: (..., C) float logits (f32 or bf16 — the cast happens in-kernel).
    labels:  (...)    integer labels; entries equal to -100 are ignored.
    Returns NaN when every label is ignored (matches torch's behaviour).
    """
    num_classes = outputs.shape[-1]
    logits = outputs.reshape(-1, num_classes)            # (N, C), original dtype
    labels_flat = labels.reshape(-1).astype(jnp.int32)   # (N,)
    n = logits.shape[0]

    n_tiles = max(1, pl.cdiv(n, tile_n))
    n_pad = n_tiles * tile_n
    # Layout plumbing (one fused XLA op, no dtype upcast): transpose to a
    # lane-dense (C, N_pad) slab and pad the token axis to a multiple of tile_n
    # with IGNORE_INDEX labels (padded tokens contribute 0 to total and count).
    logits_t = jnp.pad(logits.T, ((0, 0), (0, n_pad - n)))
    labels_p = jnp.pad(labels_flat[None, :], ((0, 0), (0, n_pad - n)),
                       constant_values=IGNORE_INDEX)

    total, count = pl.pallas_call(
        tagger_loss_kernel,
        out_shape=(jax.ShapeDtypeStruct((1, 1), jnp.float32),
                   jax.ShapeDtypeStruct((1, 1), jnp.float32)),
        grid_spec=pltpu.PrefetchScalarGridSpec(
            num_scalar_prefetch=0,
            grid=(n_tiles,),
            in_specs=[
                pl.BlockSpec((num_classes, tile_n), lambda i: (0, i)),
                pl.BlockSpec((1, tile_n), lambda i: (0, i)),
            ],
            out_specs=[
                pl.BlockSpec((1, 1), lambda i: (0, 0)),
                pl.BlockSpec((1, 1), lambda i: (0, 0)),
            ],
        ),
        compiler_params=pltpu.CompilerParams(
            # Resident accumulator across the token-tile axis.  On v7x (2 TCs)
            # a further win is to emit per-tile (total, count) partials with
            # this axis "parallel" and reduce the partials in JAX.
            dimension_semantics=("arbitrary",),
            vmem_limit_bytes=32 * 1024 * 1024),
    )(logits_t, labels_p)

    # Divide in the wrapper: kernel stays a pure accumulator (composes with a
    # per-core split / multi-call tiling); all-ignored -> NaN, same as torch.
    return total[0, 0] / count[0, 0]


# ----------------------------------------------------------------------------
# LSTM tagger forward (logits producer for the demo).
# ----------------------------------------------------------------------------
def lstm_recurrence_kernel(gx_ref, whh_ref, h_out_ref, h_sc, c_sc):
    """Grid = (batch shards, time blocks); batch "parallel", time "arbitrary".

    gx_ref   : (T_BLK, B_BLK, 4H) precomputed x @ W_ih^T + (b_ih + b_hh)
    whh_ref  : (H, 4H)            hidden->hidden weights (transposed)
    h_out_ref: (T_BLK, B_BLK, H)  hidden states for this (batch, time) block
    h_sc,c_sc: (B_BLK, H)         recurrent state carried across time blocks
    """
    @pl.when(pl.program_id(1) == 0)        # first time block of this batch shard
    def _init():
        h_sc[...] = jnp.zeros_like(h_sc)
        c_sc[...] = jnp.zeros_like(c_sc)

    hdim = h_sc.shape[-1]
    whh = whh_ref[...]
    t_blk = gx_ref.shape[0]
    for t in range(t_blk):                  # short static unroll (LLO visibility)
        gates = gx_ref[t] + jnp.dot(h_sc[...], whh,
                                    preferred_element_type=jnp.float32)  # (B,4H)
        # H is a multiple of 128, so each gate slice is whole lane tiles
        # (free view, no XLU relayout on the serial critical path).
        i_g = jax.nn.sigmoid(gates[:, 0 * hdim:1 * hdim])
        f_g = jax.nn.sigmoid(gates[:, 1 * hdim:2 * hdim])
        g_g = jnp.tanh(gates[:, 2 * hdim:3 * hdim])
        o_g = jax.nn.sigmoid(gates[:, 3 * hdim:4 * hdim])
        c_new = f_g * c_sc[...] + i_g * g_g
        h_new = o_g * jnp.tanh(c_new)
        c_sc[...] = c_new
        h_sc[...] = h_new
        h_out_ref[t] = h_new.astype(h_out_ref.dtype)


def tagger_forward(tokens, params):
    """Embedding -> hoisted input projection -> Pallas LSTM recurrence ->
    classification head.  Returns batch-first logits (B, T, C).

    Production notes (not applied at these toy f32 shapes so the tight
    reference tolerance holds):
      * stream gates_x / w_hh in bf16 with f32 h/c state + f32 dot accumulation
        (on v5e cast to f32 before the elementwise gate math — no bf16 VPU/EUP),
      * single-buffer the grid-invariant w_hh via pipeline_mode=pl.Buffered(1)
        on v7x (16 MiB at H=1024 would otherwise be double-buffered),
      * size t_blk/b_blk against the VMEM budget: 2x(t_blk,B_blk,4H) gates +
        2x(t_blk,B_blk,H) h_out + w_hh + state, within 64 MiB on v7x,
      * pack >=128 (v5e) / 256 (v6e/v7x) batch rows per step so the
        (B_blk,H)x(H,4H) matmul fills the MXU,
      * the classification head could be fused into the loss kernel so logits
        never hit HBM; kept separate here because the spec's TaggerLoss.forward
        takes logits as an explicit input.
    """
    emb = params["embedding"][tokens.T]                            # (T, B, E)
    gates_x = (jnp.einsum("tbe,eg->tbg", emb, params["w_ih_t"])
               + params["b"])                                      # (T, B, 4H)
    T, Bsz, _ = gates_x.shape
    H = params["w_hh_t"].shape[0]

    t_blk = min(T, 8)
    b_blk = Bsz if Bsz < 8 else 8
    assert T % t_blk == 0 and Bsz % b_blk == 0

    hs = pl.pallas_call(
        lstm_recurrence_kernel,
        out_shape=jax.ShapeDtypeStruct((T, Bsz, H), jnp.float32),
        grid_spec=pltpu.PrefetchScalarGridSpec(
            num_scalar_prefetch=0,
            grid=(Bsz // b_blk, T // t_blk),          # (batch shards, time blocks)
            in_specs=[
                pl.BlockSpec((t_blk, b_blk, 4 * H), lambda b, t: (t, b, 0)),
                pl.BlockSpec((H, 4 * H), lambda b, t: (0, 0)),
            ],
            out_specs=pl.BlockSpec((t_blk, b_blk, H), lambda b, t: (t, b, 0)),
            scratch_shapes=[
                pltpu.VMEM((b_blk, H), jnp.float32),   # h state
                pltpu.VMEM((b_blk, H), jnp.float32),   # c state
            ],
        ),
        compiler_params=pltpu.CompilerParams(
            # Batch shards are independent recurrences (v7x megacore split);
            # the time axis carries state and must stay sequential.
            dimension_semantics=("parallel", "arbitrary"),
            vmem_limit_bytes=32 * 1024 * 1024),
    )(gates_x, params["w_hh_t"])                       # (T, B, H)

    # Deferred head: one lane-dense matmul emitting batch-first (B, T, C).
    logits = jnp.einsum("tbh,hc->btc", hs, params["w_cls_t"]) + params["b_cls"]
    return logits


# ----------------------------------------------------------------------------
# Pure-JAX references.
# ----------------------------------------------------------------------------
def reference_tagger_forward(tokens, params):
    emb = params["embedding"][tokens]                  # (B, T, E)
    x = jnp.transpose(emb, (1, 0, 2))                  # (T, B, E)
    B = x.shape[1]
    H = params["w_hh_t"].shape[0]

    def step(carry, x_t):
        h, c = carry
        gates = x_t @ params["w_ih_t"] + h @ params["w_hh_t"] + params["b"]
        i = jax.nn.sigmoid(gates[:, 0 * H:1 * H])
        f = jax.nn.sigmoid(gates[:, 1 * H:2 * H])
        g = jnp.tanh(gates[:, 2 * H:3 * H])
        o = jax.nn.sigmoid(gates[:, 3 * H:4 * H])
        c = f * c + i * g
        h = o * jnp.tanh(c)
        return (h, c), h

    h0 = jnp.zeros((B, H), jnp.float32)
    c0 = jnp.zeros((B, H), jnp.float32)
    _, hs = jax.lax.scan(step, (h0, c0), x)            # (T, B, H)
    return jnp.einsum("tbh,hc->btc", hs, params["w_cls_t"]) + params["b_cls"]


def reference_tagger_loss(logits, labels):
    C = logits.shape[-1]
    lf = logits.reshape(-1, C).astype(jnp.float32)
    lb = labels.reshape(-1)
    valid = lb != IGNORE_INDEX
    safe = jnp.where(valid, lb, 0)
    logp = jax.nn.log_softmax(lf, axis=-1)
    nll = -jnp.take_along_axis(logp, safe[:, None], axis=-1)[:, 0]
    return jnp.sum(jnp.where(valid, nll, 0.0)) / jnp.sum(valid.astype(jnp.float32))


def make_params(key, vocab, pad_id, embed_dim, hidden_dim, num_classes):
    ks = jax.random.split(key, 6)
    scale = 0.1
    embedding = scale * jax.random.normal(ks[0], (vocab, embed_dim), jnp.float32)
    embedding = embedding.at[pad_id].set(0.0)          # padding_idx => zero row
    w_ih = scale * jax.random.normal(ks[1], (4 * hidden_dim, embed_dim), jnp.float32)
    w_hh = scale * jax.random.normal(ks[2], (4 * hidden_dim, hidden_dim), jnp.float32)
    b_ih = scale * jax.random.normal(ks[3], (4 * hidden_dim,), jnp.float32)
    b_hh = scale * jax.random.normal(ks[4], (4 * hidden_dim,), jnp.float32)
    w_cls = scale * jax.random.normal(ks[5], (num_classes, hidden_dim), jnp.float32)
    b_cls = jnp.zeros((num_classes,), jnp.float32)
    return {
        "embedding": embedding,
        "w_ih_t": w_ih.T,                              # (E, 4H)
        "w_hh_t": w_hh.T,                              # (H, 4H)
        "b": (b_ih + b_hh)[None, :],                   # (1, 4H)
        "w_cls_t": w_cls.T,                            # (H, C)
        "b_cls": b_cls[None, :],                       # (1, C)
    }


if __name__ == "__main__":
    # Small demo shapes, chosen per the performance review:
    #   H = 128 -> lane-aligned gate slices; B = 16 -> full 8-row sublanes and a
    #   2-wide "parallel" batch grid; T = 16 -> 2 time blocks so the resident
    #   h/c state and the loss accumulator are exercised across grid steps.
    B, T = 16, 16
    VOCAB, PAD_ID = 32, 0
    EMBED_DIM, HIDDEN_DIM, NUM_CLASSES = 32, 128, 8

    key = jax.random.PRNGKey(0)
    k_tok, k_par, k_lab, k_len, k_big = jax.random.split(key, 5)
    tokens = jax.random.randint(k_tok, (B, T), 0, VOCAB, dtype=jnp.int32)
    labels = jax.random.randint(k_lab, (B, T), 0, NUM_CLASSES, dtype=jnp.int32)
    # Mark trailing (padding) positions as ignored, as a tagger dataset would.
    lengths = jax.random.randint(k_len, (B, 1), 1, T + 1)
    labels = jnp.where(jnp.arange(T)[None, :] < lengths, labels, IGNORE_INDEX)

    params = make_params(k_par, VOCAB, PAD_ID, EMBED_DIM, HIDDEN_DIM, NUM_CLASSES)

    logits = tagger_forward(tokens, params)            # Pallas LSTM tagger (B,T,C)
    loss = jax.block_until_ready(tagger_loss(logits, labels))  # Pallas TaggerLoss

    ref_logits = reference_tagger_forward(tokens, params)
    ref_loss = jax.block_until_ready(reference_tagger_loss(ref_logits, labels))

    assert logits.shape == (B, T, NUM_CLASSES)
    np.testing.assert_allclose(np.asarray(logits), np.asarray(ref_logits),
                               rtol=2e-5, atol=2e-5)
    np.testing.assert_allclose(np.asarray(loss), np.asarray(ref_loss),
                               rtol=1e-5, atol=5e-5)

    # Second check: multi-tile accumulation path of the loss kernel (N not a
    # multiple of tile_n, grid of 3 steps) with bf16 logits streamed directly
    # (the f32 cast happens inside the kernel).  tile_n is shrunk only to force
    # multiple tiles at this toy N; production uses >= 512.
    kb1, kb2, kb3 = jax.random.split(k_big, 3)
    n_big = 700
    big_logits = jax.random.normal(kb1, (n_big, NUM_CLASSES),
                                   jnp.float32).astype(jnp.bfloat16)
    big_labels = jax.random.randint(kb2, (n_big,), 0, NUM_CLASSES, dtype=jnp.int32)
    big_labels = jnp.where(jax.random.bernoulli(kb3, 0.3, (n_big,)),
                           IGNORE_INDEX, big_labels)
    big_loss = jax.block_until_ready(
        tagger_loss(big_logits, big_labels, tile_n=256))
    big_ref = reference_tagger_loss(big_logits.astype(jnp.float32), big_labels)
    np.testing.assert_allclose(np.asarray(big_loss), np.asarray(big_ref),
                               rtol=1e-5, atol=5e-5)

    assert np.isfinite(float(loss)) and np.isfinite(float(big_loss))
    print("KERNEL_OK")
</pallas_src>

<mosaic_0001>
module attributes {stable_mosaic.version = 11 : i64} {
  func.func @lstm_recurrence_kernel(%arg0: i32, %arg1: i32, %arg2: memref<8x8x512xf32, #tpu.memory_space<vmem>>, %arg3: memref<128x512xf32, #tpu.memory_space<vmem>>, %arg4: memref<8x8x128xf32, #tpu.memory_space<vmem>>, %arg5: memref<8x128xf32, #tpu.memory_space<vmem>>, %arg6: memref<8x128xf32, #tpu.memory_space<vmem>>) attributes {dimension_semantics = [#tpu.dimension_semantics<parallel>, #tpu.dimension_semantics<arbitrary>], iteration_bounds = array<i64: 2, 2>, scalar_prefetch = 0 : i64, scratch_operands = 2 : i64, tpu.core_type = #tpu.core_type<tc>, window_params = [{transform_indices = @transform_0, window_bounds = array<i64: 8, 8, 512>}, {pipeline_mode = #tpu.pipeline_mode<synchronous>, transform_indices = @transform_1, window_bounds = array<i64: 128, 512>}, {transform_indices = @transform_2, window_bounds = array<i64: 8, 8, 128>}]} {
    %c0_i32 = arith.constant 0 : i32
    %0 = arith.cmpi eq, %arg1, %c0_i32 : i32
    %1 = arith.extui %0 : i1 to i32
    %c0_i32_0 = arith.constant 0 : i32
    %2 = arith.cmpi ne, %1, %c0_i32_0 : i32
    scf.if %2 {
      %cst_138 = arith.constant 0.000000e+00 : f32
      %292 = vector.broadcast %cst_138 : f32 to vector<8x128xf32>
      %c0_139 = arith.constant 0 : index
      %c0_140 = arith.constant 0 : index
      %293 = vector.load %arg5[%c0_139, %c0_140] : memref<8x128xf32, #tpu.memory_space<vmem>>, vector<8x128xf32>
      tpu.vector_store %arg5[%c0_139, %c0_140], %292 {strides = array<i32>} : memref<8x128xf32, #tpu.memory_space<vmem>>, vector<8x128xf32>,
      %cst_141 = arith.constant 0.000000e+00 : f32
      %294 = vector.broadcast %cst_141 : f32 to vector<8x128xf32>
      %c0_142 = arith.constant 0 : index
      %c0_143 = arith.constant 0 : index
      %295 = vector.load %arg6[%c0_142, %c0_143] : memref<8x128xf32, #tpu.memory_space<vmem>>, vector<8x128xf32>
      tpu.vector_store %arg6[%c0_142, %c0_143], %294 {strides = array<i32>} : memref<8x128xf32, #tpu.memory_space<vmem>>, vector<8x128xf32>,
    } else {
    }
    %c0 = arith.constant 0 : index
    %c0_1 = arith.constant 0 : index
    %3 = vector.load %arg3[%c0, %c0_1] : memref<128x512xf32, #tpu.memory_space<vmem>>, vector<128x512xf32>
    %c0_2 = arith.constant 0 : index
    %c0_3 = arith.constant 0 : index
    %c0_4 = arith.constant 0 : index
    %4 = vector.load %arg2[%c0_2, %c0_3, %c0_4] : memref<8x8x512xf32, #tpu.memory_space<vmem>>, vector<1x8x512xf32>
    %5 = vector.shape_cast %4 : vector<1x8x512xf32> to vector<8x512xf32>
    %c0_5 = arith.constant 0 : index
    %c0_6 = arith.constant 0 : index
    %6 = vector.load %arg5[%c0_5, %c0_6] : memref<8x128xf32, #tpu.memory_space<vmem>>, vector<8x128xf32>
    %cst = arith.constant dense<0.000000e+00> : vector<8x512xf32>
    %7 = tpu.matmul %6, %3, %cst {dimension_numbers = #tpu.dot_dimension_numbers<[1], [0], [0], [1], [0, 0, 1, 1], [], []>} : vector<8x128xf32>, vector<128x512xf32>, vector<8x512xf32> -> vector<8x512xf32>
    %8 = arith.addf %5, %7 : vector<8x512xf32>
    %9 = vector.extract_strided_slice %8 {offsets = [0, 0], sizes = [8, 128], strides = [1, 1]} : vector<8x512xf32> to vector<8x128xf32>
    %10 = arith.negf %9 : vector<8x128xf32>
    %11 = math.exp %10 : vector<8x128xf32>
    %cst_7 = arith.constant 1.000000e+00 : f32
    %12 = vector.broadcast %cst_7 : f32 to vector<8x128xf32>
    %13 = arith.addf %12, %11 : vector<8x128xf32>
    %14 = arith.divf %12, %13 : vector<8x128xf32>
    %15 = vector.extract_strided_slice %8 {offsets = [0, 128], sizes = [8, 128], strides = [1, 1]} : vector<8x512xf32> to vector<8x128xf32>
    %16 = arith.negf %15 : vector<8x128xf32>
    %17 = math.exp %16 : vector<8x128xf32>
    %cst_8 = arith.constant 1.000000e+00 : f32
    %18 = vector.broadcast %cst_8 : f32 to vector<8x128xf32>
    %19 = arith.addf %18, %17 : vector<8x128xf32>
    %20 = arith.divf %18, %19 : vector<8x128xf32>
    %21 = vector.extract_strided_slice %8 {offsets = [0, 256], sizes = [8, 128], strides = [1, 1]} : vector<8x512xf32> to vector<8x128xf32>
    %22 = math.tanh %21 : vector<8x128xf32>
    %23 = vector.extract_strided_slice %8 {offsets = [0, 384], sizes = [8, 128], strides = [1, 1]} : vector<8x512xf32> to vector<8x128xf32>
    %24 = arith.negf %23 : vector<8x128xf32>
    %25 = math.exp %24 : vector<8x128xf32>
    %cst_9 = arith.constant 1.000000e+00 : f32
    %26 = vector.broadcast %cst_9 : f32 to vector<8x128xf32>
    %27 = arith.addf %26, %25 : vector<8x128xf32>
    %28 = arith.divf %26, %27 : vector<8x128xf32>
    %c0_10 = arith.constant 0 : index
    %c0_11 = arith.constant 0 : index
    %29 = vector.load %arg6[%c0_10, %c0_11] : memref<8x128xf32, #tpu.memory_space<vmem>>, vector<8x128xf32>
    %30 = arith.mulf %20, %29 : vector<8x128xf32>
    %31 = arith.mulf %14, %22 : vector<8x128xf32>
    %32 = arith.addf %30, %31 : vector<8x128xf32>
    %33 = math.tanh %32 : vector<8x128xf32>
    %34 = arith.mulf %28, %33 : vector<8x128xf32>
    %c0_12 = arith.constant 0 : index
    %c0_13 = arith.constant 0 : index
    %35 = vector.load %arg6[%c0_12, %c0_13] : memref<8x128xf32, #tpu.memory_space<vmem>>, vector<8x128xf32>
    tpu.vector_store %arg6[%c0_12, %c0_13], %32 {strides = array<i32>} : memref<8x128xf32, #tpu.memory_space<vmem>>, vector<8x128xf32>,
    %c0_14 = arith.constant 0 : index
    %c0_15 = arith.constant 0 : index
    %36 = vector.load %arg5[%c0_14, %c0_15] : memref<8x128xf32, #tpu.memory_space<vmem>>, vector<8x128xf32>
    tpu.vector_store %arg5[%c0_14, %c0_15], %34 {strides = array<i32>} : memref<8x128xf32, #tpu.memory_space<vmem>>, vector<8x128xf32>,
    %c0_16 = arith.constant 0 : index
    %c0_17 = arith.constant 0 : index
    %c0_18 = arith.constant 0 : index
    %37 = vector.load %arg4[%c0_16, %c0_17, %c0_18] : memref<8x8x128xf32, #tpu.memory_space<vmem>>, vector<1x8x128xf32>
    %38 = vector.shape_cast %37 : vector<1x8x128xf32> to vector<8x128xf32>
    %39 = vector.shape_cast %34 : vector<8x128xf32> to vector<1x8x128xf32>
    tpu.vector_store %arg4[%c0_16, %c0_17, %c0_18], %39 {strides = array<i32>} : memref<8x8x128xf32, #tpu.memory_space<vmem>>, vector<1x8x128xf32>,
    %c1 = arith.constant 1 : index
    %c0_19 = arith.constant 0 : index
    %c0_20 = arith.constant 0 : index
    %40 = vector.load %arg2[%c1, %c0_19, %c0_20] : memref<8x8x512xf32, #tpu.memory_space<vmem>>, vector<1x8x512xf32>
    %41 = vector.shape_cast %40 : vector<1x8x512xf32> to vector<8x512xf32>
    %c0_21 = arith.constant 0 : index
    %c0_22 = arith.constant 0 : index
    %42 = vector.load %arg5[%c0_21, %c0_22] : memref<8x128xf32, #tpu.memory_space<vmem>>, vector<8x128xf32>
    %cst_23 = arith.constant dense<0.000000e+00> : vector<8x512xf32>
    %43 = tpu.matmul %42, %3, %cst_23 {dimension_numbers = #tpu.dot_dimension_numbers<[1], [0], [0], [1], [0, 0, 1, 1], [], []>} : vector<8x128xf32>, vector<128x512xf32>, vector<8x512xf32> -> vector<8x512xf32>
    %44 = arith.addf %41, %43 : vector<8x512xf32>
    %45 = vector.extract_strided_slice %44 {offsets = [0, 0], sizes = [8, 128], strides = [1, 1]} : vector<8x512xf32> to vector<8x128xf32>
    %46 = arith.negf %45 : vector<8x128xf32>
    %47 = math.exp %46 : vector<8x128xf32>
    %cst_24 = arith.constant 1.000000e+00 : f32
    %48 = vector.broadcast %cst_24 : f32 to vector<8x128xf32>
    %49 = arith.addf %48, %47 : vector<8x128xf32>
    %50 = arith.divf %48, %49 : vector<8x128xf32>
    %51 = vector.extract_strided_slice %44 {offsets = [0, 128], sizes = [8, 128], strides = [1, 1]} : vector<8x512xf32> to vector<8x128xf32>
    %52 = arith.negf %51 : vector<8x128xf32>
    %53 = math.exp %52 : vector<8x128xf32>
    %cst_25 = arith.constant 1.000000e+00 : f32
    %54 = vector.broadcast %cst_25 : f32 to vector<8x128xf32>
    %55 = arith.addf %54, %53 : vector<8x128xf32>
    %56 = arith.divf %54, %55 : vector<8x128xf32>
    %57 = vector.extract_strided_slice %44 {offsets = [0, 256], sizes = [8, 128], strides = [1, 1]} : vector<8x512xf32> to vector<8x128xf32>
    %58 = math.tanh %57 : vector<8x128xf32>
    %59 = vector.extract_strided_slice %44 {offsets = [0, 384], sizes = [8, 128], strides = [1, 1]} : vector<8x512xf32> to vector<8x128xf32>
    %60 = arith.negf %59 : vector<8x128xf32>
    %61 = math.exp %60 : vector<8x128xf32>
    %cst_26 = arith.constant 1.000000e+00 : f32
    %62 = vector.broadcast %cst_26 : f32 to vector<8x128xf32>
    %63 = arith.addf %62, %61 : vector<8x128xf32>
    %64 = arith.divf %62, %63 : vector<8x128xf32>
    %c0_27 = arith.constant 0 : index
    %c0_28 = arith.constant 0 : index
    %65 = vector.load %arg6[%c0_27, %c0_28] : memref<8x128xf32, #tpu.memory_space<vmem>>, vector<8x128xf32>
    %66 = arith.mulf %56, %65 : vector<8x128xf32>
    %67 = arith.mulf %50, %58 : vector<8x128xf32>
    %68 = arith.addf %66, %67 : vector<8x128xf32>
    %69 = math.tanh %68 : vector<8x128xf32>
    %70 = arith.mulf %64, %69 : vector<8x128xf32>
    %c0_29 = arith.constant 0 : index
    %c0_30 = arith.constant 0 : index
    %71 = vector.load %arg6[%c0_29, %c0_30] : memref<8x128xf32, #tpu.memory_space<vmem>>, vector<8x128xf32>
    tpu.vector_store %arg6[%c0_29, %c0_30], %68 {strides = array<i32>} : memref<8x128xf32, #tpu.memory_space<vmem>>, vector<8x128xf32>,
    %c0_31 = arith.constant 0 : index
    %c0_32 = arith.constant 0 : index
    %72 = vector.load %arg5[%c0_31, %c0_32] : memref<8x128xf32, #tpu.memory_space<vmem>>, vector<8x128xf32>
    tpu.vector_store %arg5[%c0_31, %c0_32], %70 {strides = array<i32>} : memref<8x128xf32, #tpu.memory_space<vmem>>, vector<8x128xf32>,
    %c1_33 = arith.constant 1 : index
    %c0_34 = arith.constant 0 : index
    %c0_35 = arith.constant 0 : index
    %73 = vector.load %arg4[%c1_33, %c0_34, %c0_35] : memref<8x8x128xf32, #tpu.memory_space<vmem>>, vector<1x8x128xf32>
    %74 = vector.shape_cast %73 : vector<1x8x128xf32> to vector<8x128xf32>
    %75 = vector.shape_cast %70 : vector<8x128xf32> to vector<1x8x128xf32>
    tpu.vector_store %arg4[%c1_33, %c0_34, %c0_35], %75 {strides = array<i32>} : memref<8x8x128xf32, #tpu.memory_space<vmem>>, vector<1x8x128xf32>,
    %c2 = arith.constant 2 : index
    %c0_36 = arith.constant 0 : index
    %c0_37 = arith.constant 0 : index
    %76 = vector.load %arg2[%c2, %c0_36, %c0_37] : memref<8x8x512xf32, #tpu.memory_space<vmem>>, vector<1x8x512xf32>
    %77 = vector.shape_cast %76 : vector<1x8x512xf32> to vector<8x512xf32>
    %c0_38 = arith.constant 0 : index
    %c0_39 = arith.constant 0 : index
    %78 = vector.load %arg5[%c0_38, %c0_39] : memref<8x128xf32, #tpu.memory_space<vmem>>, vector<8x128xf32>
    %cst_40 = arith.constant dense<0.000000e+00> : vector<8x512xf32>
    %79 = tpu.matmul %78, %3, %cst_40 {dimension_numbers = #tpu.dot_dimension_numbers<[1], [0], [0], [1], [0, 0, 1, 1], [], []>} : vector<8x128xf32>, vector<128x512xf32>, vector<8x512xf32> -> vector<8x512xf32>
    %80 = arith.addf %77, %79 : vector<8x512xf32>
    %81 = vector.extract_strided_slice %80 {offsets = [0, 0], sizes = [8, 128], strides = [1, 1]} : vector<8x512xf32> to vector<8x128xf32>
    %82 = arith.negf %81 : vector<8x128xf32>
    %83 = math.exp %82 : vector<8x128xf32>
    %cst_41 = arith.constant 1.000000e+00 : f32
    %84 = vector.broadcast %cst_41 : f32 to vector<8x128xf32>
    %85 = arith.addf %84, %83 : vector<8x128xf32>
    %86 = arith.divf %84, %85 : vector<8x128xf32>
    %87 = vector.extract_strided_slice %80 {offsets = [0, 128], sizes = [8, 128], strides = [1, 1]} : vector<8x512xf32> to vector<8x128xf32>
    %88 = arith.negf %87 : vector<8x128xf32>
    %89 = math.exp %88 : vector<8x128xf32>
    %cst_42 = arith.constant 1.000000e+00 : f32
    %90 = vector.broadcast %cst_42 : f32 to vector<8x128xf32>
    %91 = arith.addf %90, %89 : vector<8x128xf32>
    %92 = arith.divf %90, %91 : vector<8x128xf32>
    %93 = vector.extract_strided_slice %80 {offsets = [0, 256], sizes = [8, 128], strides = [1, 1]} : vector<8x512xf32> to vector<8x128xf32>
    %94 = math.tanh %93 : vector<8x128xf32>
    %95 = vector.extract_strided_slice %80 {offsets = [0, 384], sizes = [8, 128], strides = [1, 1]} : vector<8x512xf32> to vector<8x128xf32>
    %96 = arith.negf %95 : vector<8x128xf32>
    %97 = math.exp %96 : vector<8x128xf32>
    %cst_43 = arith.constant 1.000000e+00 : f32
    %98 = vector.broadcast %cst_43 : f32 to vector<8x128xf32>
    %99 = arith.addf %98, %97 : vector<8x128xf32>
    %100 = arith.divf %98, %99 : vector<8x128xf32>
    %c0_44 = arith.constant 0 : index
    %c0_45 = arith.constant 0 : index
    %101 = vector.load %arg6[%c0_44, %c0_45] : memref<8x128xf32, #tpu.memory_space<vmem>>, vector<8x128xf32>
    %102 = arith.mulf %92, %101 : vector<8x128xf32>
    %103 = arith.mulf %86, %94 : vector<8x128xf32>
    %104 = arith.addf %102, %103 : vector<8x128xf32>
    %105 = math.tanh %104 : vector<8x128xf32>
    %106 = arith.mulf %100, %105 : vector<8x128xf32>
    %c0_46 = arith.constant 0 : index
    %c0_47 = arith.constant 0 : index
    %107 = vector.load %arg6[%c0_46, %c0_47] : memref<8x128xf32, #tpu.memory_space<vmem>>, vector<8x128xf32>
    tpu.vector_store %arg6[%c0_46, %c0_47], %104 {strides = array<i32>} : memref<8x128xf32, #tpu.memory_space<vmem>>, vector<8x128xf32>,
    %c0_48 = arith.constant 0 : index
    %c0_49 = arith.constant 0 : index
    %108 = vector.load %arg5[%c0_48, %c0_49] : memref<8x128xf32, #tpu.memory_space<vmem>>, vector<8x128xf32>
    tpu.vector_store %arg5[%c0_48, %c0_49], %106 {strides = array<i32>} : memref<8x128xf32, #tpu.memory_space<vmem>>, vector<8x128xf32>,
    %c2_50 = arith.constant 2 : index
    %c0_51 = arith.constant 0 : index
    %c0_52 = arith.constant 0 : index
    %109 = vector.load %arg4[%c2_50, %c0_51, %c0_52] : memref<8x8x128xf32, #tpu.memory_space<vmem>>, vector<1x8x128xf32>
    %110 = vector.shape_cast %109 : vector<1x8x128xf32> to vector<8x128xf32>
    %111 = vector.shape_cast %106 : vector<8x128xf32> to vector<1x8x128xf32>
    tpu.vector_store %arg4[%c2_50, %c0_51, %c0_52], %111 {strides = array<i32>} : memref<8x8x128xf32, #tpu.memory_space<vmem>>, vector<1x8x128xf32>,
    %c3 = arith.constant 3 : index
    %c0_53 = arith.constant 0 : index
    %c0_54 = arith.constant 0 : index
    %112 = vector.load %arg2[%c3, %c0_53, %c0_54] : memref<8x8x512xf32, #tpu.memory_space<vmem>>, vector<1x8x512xf32>
    %113 = vector.shape_cast %112 : vector<1x8x512xf32> to vector<8x512xf32>
    %c0_55 = arith.constant 0 : index
    %c0_56 = arith.constant 0 : index
    %114 = vector.load %arg5[%c0_55, %c0_56] : memref<8x128xf32, #tpu.memory_space<vmem>>, vector<8x128xf32>
    %cst_57 = arith.constant dense<0.000000e+00> : vector<8x512xf32>
    %115 = tpu.matmul %114, %3, %cst_57 {dimension_numbers = #tpu.dot_dimension_numbers<[1], [0], [0], [1], [0, 0, 1, 1], [], []>} : vector<8x128xf32>, vector<128x512xf32>, vector<8x512xf32> -> vector<8x512xf32>
    %116 = arith.addf %113, %115 : vector<8x512xf32>
    %117 = vector.extract_strided_slice %116 {offsets = [0, 0], sizes = [8, 128], strides = [1, 1]} : vector<8x512xf32> to vector<8x128xf32>
    %118 = arith.negf %117 : vector<8x128xf32>
    %119 = math.exp %118 : vector<8x128xf32>
    %cst_58 = arith.constant 1.000000e+00 : f32
    %120 = vector.broadcast %cst_58 : f32 to vector<8x128xf32>
    %121 = arith.addf %120, %119 : vector<8x128xf32>
    %122 = arith.divf %120, %121 : vector<8x128xf32>
    %123 = vector.extract_strided_slice %116 {offsets = [0, 128], sizes = [8, 128], strides = [1, 1]} : vector<8x512xf32> to vector<8x128xf32>
    %124 = arith.negf %123 : vector<8x128xf32>
    %125 = math.exp %124 : vector<8x128xf32>
    %cst_59 = arith.constant 1.000000e+00 : f32
    %126 = vector.broadcast %cst_59 : f32 to vector<8x128xf32>
    %127 = arith.addf %126, %125 : vector<8x128xf32>
    %128 = arith.divf %126, %127 : vector<8x128xf32>
    %129 = vector.extract_strided_slice %116 {offsets = [0, 256], sizes = [8, 128], strides = [1, 1]} : vector<8x512xf32> to vector<8x128xf32>
    %130 = math.tanh %129 : vector<8x128xf32>
    %131 = vector.extract_strided_slice %116 {offsets = [0, 384], sizes = [8, 128], strides = [1, 1]} : vector<8x512xf32> to vector<8x128xf32>
    %132 = arith.negf %131 : vector<8x128xf32>
    %133 = math.exp %132 : vector<8x128xf32>
    %cst_60 = arith.constant 1.000000e+00 : f32
    %134 = vector.broadcast %cst_60 : f32 to vector<8x128xf32>
    %135 = arith.addf %134, %133 : vector<8x128xf32>
    %136 = arith.divf %134, %135 : vector<8x128xf32>
    %c0_61 = arith.constant 0 : index
    %c0_62 = arith.constant 0 : index
    %137 = vector.load %arg6[%c0_61, %c0_62] : memref<8x128xf32, #tpu.memory_space<vmem>>, vector<8x128xf32>
    %138 = arith.mulf %128, %137 : vector<8x128xf32>
    %139 = arith.mulf %122, %130 : vector<8x128xf32>
    %140 = arith.addf %138, %139 : vector<8x128xf32>
    %141 = math.tanh %140 : vector<8x128xf32>
    %142 = arith.mulf %136, %141 : vector<8x128xf32>
    %c0_63 = arith.constant 0 : index
    %c0_64 = arith.constant 0 : index
    %143 = vector.load %arg6[%c0_63, %c0_64] : memref<8x128xf32, #tpu.memory_space<vmem>>, vector<8x128xf32>
    tpu.vector_store %arg6[%c0_63, %c0_64], %140 {strides = array<i32>} : memref<8x128xf32, #tpu.memory_space<vmem>>, vector<8x128xf32>,
    %c0_65 = arith.constant 0 : index
    %c0_66 = arith.constant 0 : index
    %144 = vector.load %arg5[%c0_65, %c0_66] : memref<8x128xf32, #tpu.memory_space<vmem>>, vector<8x128xf32>
    tpu.vector_store %arg5[%c0_65, %c0_66], %142 {strides = array<i32>} : memref<8x128xf32, #tpu.memory_space<vmem>>, vector<8x128xf32>,
    %c3_67 = arith.constant 3 : index
    %c0_68 = arith.constant 0 : index
    %c0_69 = arith.constant 0 : index
    %145 = vector.load %arg4[%c3_67, %c0_68, %c0_69] : memref<8x8x128xf32, #tpu.memory_space<vmem>>, vector<1x8x128xf32>
    %146 = vector.shape_cast %145 : vector<1x8x128xf32> to vector<8x128xf32>
    %147 = vector.shape_cast %142 : vector<8x128xf32> to vector<1x8x128xf32>
    tpu.vector_store %arg4[%c3_67, %c0_68, %c0_69], %147 {strides = array<i32>} : memref<8x8x128xf32, #tpu.memory_space<vmem>>, vector<1x8x128xf32>,
    %c4 = arith.constant 4 : index
    %c0_70 = arith.constant 0 : index
    %c0_71 = arith.constant 0 : index
    %148 = vector.load %arg2[%c4, %c0_70, %c0_71] : memref<8x8x512xf32, #tpu.memory_space<vmem>>, vector<1x8x512xf32>
    %149 = vector.shape_cast %148 : vector<1x8x512xf32> to vector<8x512xf32>
    %c0_72 = arith.constant 0 : index
    %c0_73 = arith.constant 0 : index
    %150 = vector.load %arg5[%c0_72, %c0_73] : memref<8x128xf32, #tpu.memory_space<vmem>>, vector<8x128xf32>
    %cst_74 = arith.constant dense<0.000000e+00> : vector<8x512xf32>
    %151 = tpu.matmul %150, %3, %cst_74 {dimension_numbers = #tpu.dot_dimension_numbers<[1], [0], [0], [1], [0, 0, 1, 1], [], []>} : vector<8x128xf32>, vector<128x512xf32>, vector<8x512xf32> -> vector<8x512xf32>
    %152 = arith.addf %149, %151 : vector<8x512xf32>
    %153 = vector.extract_strided_slice %152 {offsets = [0, 0], sizes = [8, 128], strides = [1, 1]} : vector<8x512xf32> to vector<8x128xf32>
    %154 = arith.negf %153 : vector<8x128xf32>
    %155 = math.exp %154 : vector<8x128xf32>
    %cst_75 = arith.constant 1.000000e+00 : f32
    %156 = vector.broadcast %cst_75 : f32 to vector<8x128xf32>
    %157 = arith.addf %156, %155 : vector<8x128xf32>
    %158 = arith.divf %156, %157 : vector<8x128xf32>
    %159 = vector.extract_strided_slice %152 {offsets = [0, 128], sizes = [8, 128], strides = [1, 1]} : vector<8x512xf32> to vector<8x128xf32>
    %160 = arith.negf %159 : vector<8x128xf32>
    %161 = math.exp %160 : vector<8x128xf32>
    %cst_76 = arith.constant 1.000000e+00 : f32
    %162 = vector.broadcast %cst_76 : f32 to vector<8x128xf32>
    %163 = arith.addf %162, %161 : vector<8x128xf32>
    %164 = arith.divf %162, %163 : vector<8x128xf32>
    %165 = vector.extract_strided_slice %152 {offsets = [0, 256], sizes = [8, 128], strides = [1, 1]} : vector<8x512xf32> to vector<8x128xf32>
    %166 = math.tanh %165 : vector<8x128xf32>
    %167 = vector.extract_strided_slice %152 {offsets = [0, 384], sizes = [8, 128], strides = [1, 1]} : vector<8x512xf32> to vector<8x128xf32>
    %168 = arith.negf %167 : vector<8x128xf32>
    %169 = math.exp %168 : vector<8x128xf32>
    %cst_77 = arith.constant 1.000000e+00 : f32
    %170 = vector.broadcast %cst_77 : f32 to vector<8x128xf32>
    %171 = arith.addf %170, %169 : vector<8x128xf32>
    %172 = arith.divf %170, %171 : vector<8x128xf32>
    %c0_78 = arith.constant 0 : index
    %c0_79 = arith.constant 0 : index
    %173 = vector.load %arg6[%c0_78, %c0_79] : memref<8x128xf32, #tpu.memory_space<vmem>>, vector<8x128xf32>
    %174 = arith.mulf %164, %173 : vector<8x128xf32>
    %175 = arith.mulf %158, %166 : vector<8x128xf32>
    %176 = arith.addf %174, %175 : vector<8x128xf32>
    %177 = math.tanh %176 : vector<8x128xf32>
    %178 = arith.mulf %172, %177 : vector<8x128xf32>
    %c0_80 = arith.constant 0 : index
    %c0_81 = arith.constant 0 : index
    %179 = vector.load %arg6[%c0_80, %c0_81] : memref<8x128xf32, #tpu.memory_space<vmem>>, vector<8x128xf32>
    tpu.vector_store %arg6[%c0_80, %c0_81], %176 {strides = array<i32>} : memref<8x128xf32, #tpu.memory_space<vmem>>, vector<8x128xf32>,
    %c0_82 = arith.constant 0 : index
    %c0_83 = arith.constant 0 : index
    %180 = vector.load %arg5[%c0_82, %c0_83] : memref<8x128xf32, #tpu.memory_space<vmem>>, vector<8x128xf32>
    tpu.vector_store %arg5[%c0_82, %c0_83], %178 {strides = array<i32>} : memref<8x128xf32, #tpu.memory_space<vmem>>, vector<8x128xf32>,
    %c4_84 = arith.constant 4 : index
    %c0_85 = arith.constant 0 : index
    %c0_86 = arith.constant 0 : index
    %181 = vector.load %arg4[%c4_84, %c0_85, %c0_86] : memref<8x8x128xf32, #tpu.memory_space<vmem>>, vector<1x8x128xf32>
    %182 = vector.shape_cast %181 : vector<1x8x128xf32> to vector<8x128xf32>
    %183 = vector.shape_cast %178 : vector<8x128xf32> to vector<1x8x128xf32>
    tpu.vector_store %arg4[%c4_84, %c0_85, %c0_86], %183 {strides = array<i32>} : memref<8x8x128xf32, #tpu.memory_space<vmem>>, vector<1x8x128xf32>,
    %c5 = arith.constant 5 : index
    %c0_87 = arith.constant 0 : index
    %c0_88 = arith.constant 0 : index
    %184 = vector.load %arg2[%c5, %c0_87, %c0_88] : memref<8x8x512xf32, #tpu.memory_space<vmem>>, vector<1x8x512xf32>
    %185 = vector.shape_cast %184 : vector<1x8x512xf32> to vector<8x512xf32>
    %c0_89 = arith.constant 0 : index
    %c0_90 = arith.constant 0 : index
    %186 = vector.load %arg5[%c0_89, %c0_90] : memref<8x128xf32, #tpu.memory_space<vmem>>, vector<8x128xf32>
    %cst_91 = arith.constant dense<0.000000e+00> : vector<8x512xf32>
    %187 = tpu.matmul %186, %3, %cst_91 {dimension_numbers = #tpu.dot_dimension_numbers<[1], [0], [0], [1], [0, 0, 1, 1], [], []>} : vector<8x128xf32>, vector<128x512xf32>, vector<8x512xf32> -> vector<8x512xf32>
    %188 = arith.addf %185, %187 : vector<8x512xf32>
    %189 = vector.extract_strided_slice %188 {offsets = [0, 0], sizes = [8, 128], strides = [1, 1]} : vector<8x512xf32> to vector<8x128xf32>
    %190 = arith.negf %189 : vector<8x128xf32>
    %191 = math.exp %190 : vector<8x128xf32>
    %cst_92 = arith.constant 1.000000e+00 : f32
    %192 = vector.broadcast %cst_92 : f32 to vector<8x128xf32>
    %193 = arith.addf %192, %191 : vector<8x128xf32>
    %194 = arith.divf %192, %193 : vector<8x128xf32>
    %195 = vector.extract_strided_slice %188 {offsets = [0, 128], sizes = [8, 128], strides = [1, 1]} : vector<8x512xf32> to vector<8x128xf32>
    %196 = arith.negf %195 : vector<8x128xf32>
    %197 = math.exp %196 : vector<8x128xf32>
    %cst_93 = arith.constant 1.000000e+00 : f32
    %198 = vector.broadcast %cst_93 : f32 to vector<8x128xf32>
    %199 = arith.addf %198, %197 : vector<8x128xf32>
    %200 = arith.divf %198, %199 : vector<8x128xf32>
    %201 = vector.extract_strided_slice %188 {offsets = [0, 256], sizes = [8, 128], strides = [1, 1]} : vector<8x512xf32> to vector<8x128xf32>
    %202 = math.tanh %201 : vector<8x128xf32>
    %203 = vector.extract_strided_slice %188 {offsets = [0, 384], sizes = [8, 128], strides = [1, 1]} : vector<8x512xf32> to vector<8x128xf32>
    %204 = arith.negf %203 : vector<8x128xf32>
    %205 = math.exp %204 : vector<8x128xf32>
    %cst_94 = arith.constant 1.000000e+00 : f32
    %206 = vector.broadcast %cst_94 : f32 to vector<8x128xf32>
    %207 = arith.addf %206, %205 : vector<8x128xf32>
    %208 = arith.divf %206, %207 : vector<8x128xf32>
    %c0_95 = arith.constant 0 : index
    %c0_96 = arith.constant 0 : index
    %209 = vector.load %arg6[%c0_95, %c0_96] : memref<8x128xf32, #tpu.memory_space<vmem>>, vector<8x128xf32>
    %210 = arith.mulf %200, %209 : vector<8x128xf32>
    %211 = arith.mulf %194, %202 : vector<8x128xf32>
    %212 = arith.addf %210, %211 : vector<8x128xf32>
    %213 = math.tanh %212 : vector<8x128xf32>
    %214 = arith.mulf %208, %213 : vector<8x128xf32>
    %c0_97 = arith.constant 0 : index
    %c0_98 = arith.constant 0 : index
    %215 = vector.load %arg6[%c0_97, %c0_98] : memref<8x128xf32, #tpu.memory_space<vmem>>, vector<8x128xf32>
    tpu.vector_store %arg6[%c0_97, %c0_98], %212 {strides = array<i32>} : memref<8x128xf32, #tpu.memory_space<vmem>>, vector<8x128xf32>,
    %c0_99 = arith.constant 0 : index
    %c0_100 = arith.constant 0 : index
    %216 = vector.load %arg5[%c0_99, %c0_100] : memref<8x128xf32, #tpu.memory_space<vmem>>, vector<8x128xf32>
    tpu.vector_store %arg5[%c0_99, %c0_100], %214 {strides = array<i32>} : memref<8x128xf32, #tpu.memory_space<vmem>>, vector<8x128xf32>,
    %c5_101 = arith.constant 5 : index
    %c0_102 = arith.constant 0 : index
    %c0_103 = arith.constant 0 : index
    %217 = vector.load %arg4[%c5_101, %c0_102, %c0_103] : memref<8x8x128xf32, #tpu.memory_space<vmem>>, vector<1x8x128xf32>
    %218 = vector.shape_cast %217 : vector<1x8x128xf32> to vector<8x128xf32>
    %219 = vector.shape_cast %214 : vector<8x128xf32> to vector<1x8x128xf32>
    tpu.vector_store %arg4[%c5_101, %c0_102, %c0_103], %219 {strides = array<i32>} : memref<8x8x128xf32, #tpu.memory_space<vmem>>, vector<1x8x128xf32>,
    %c6 = arith.constant 6 : index
    %c0_104 = arith.constant 0 : index
    %c0_105 = arith.constant 0 : index
    %220 = vector.load %arg2[%c6, %c0_104, %c0_105] : memref<8x8x512xf32, #tpu.memory_space<vmem>>, vector<1x8x512xf32>
    %221 = vector.shape_cast %220 : vector<1x8x512xf32> to vector<8x512xf32>
    %c0_106 = arith.constant 0 : index
    %c0_107 = arith.constant 0 : index
    %222 = vector.load %arg5[%c0_106, %c0_107] : memref<8x128xf32, #tpu.memory_space<vmem>>, vector<8x128xf32>
    %cst_108 = arith.constant dense<0.000000e+00> : vector<8x512xf32>
    %223 = tpu.matmul %222, %3, %cst_108 {dimension_numbers = #tpu.dot_dimension_numbers<[1], [0], [0], [1], [0, 0, 1, 1], [], []>} : vector<8x128xf32>, vector<128x512xf32>, vector<8x512xf32> -> vector<8x512xf32>
    %224 = arith.addf %221, %223 : vector<8x512xf32>
    %225 = vector.extract_strided_slice %224 {offsets = [0, 0], sizes = [8, 128], strides = [1, 1]} : vector<8x512xf32> to vector<8x128xf32>
    %226 = arith.negf %225 : vector<8x128xf32>
    %227 = math.exp %226 : vector<8x128xf32>
    %cst_109 = arith.constant 1.000000e+00 : f32
    %228 = vector.broadcast %cst_109 : f32 to vector<8x128xf32>
    %229 = arith.addf %228, %227 : vector<8x128xf32>
    %230 = arith.divf %228, %229 : vector<8x128xf32>
    %231 = vector.extract_strided_slice %224 {offsets = [0, 128], sizes = [8, 128], strides = [1, 1]} : vector<8x512xf32> to vector<8x128xf32>
    %232 = arith.negf %231 : vector<8x128xf32>
    %233 = math.exp %232 : vector<8x128xf32>
    %cst_110 = arith.constant 1.000000e+00 : f32
    %234 = vector.broadcast %cst_110 : f32 to vector<8x128xf32>
    %235 = arith.addf %234, %233 : vector<8x128xf32>
    %236 = arith.divf %234, %235 : vector<8x128xf32>
    %237 = vector.extract_strided_slice %224 {offsets = [0, 256], sizes = [8, 128], strides = [1, 1]} : vector<8x512xf32> to vector<8x128xf32>
    %238 = math.tanh %237 : vector<8x128xf32>
    %239 = vector.extract_strided_slice %224 {offsets = [0, 384], sizes = [8, 128], strides = [1, 1]} : vector<8x512xf32> to vector<8x128xf32>
    %240 = arith.negf %239 : vector<8x128xf32>
    %241 = math.exp %240 : vector<8x128xf32>
    %cst_111 = arith.constant 1.000000e+00 : f32
    %242 = vector.broadcast %cst_111 : f32 to vector<8x128xf32>
    %243 = arith.addf %242, %241 : vector<8x128xf32>
    %244 = arith.divf %242, %243 : vector<8x128xf32>
    %c0_112 = arith.constant 0 : index
    %c0_113 = arith.constant 0 : index
    %245 = vector.load %arg6[%c0_112, %c0_113] : memref<8x128xf32, #tpu.memory_space<vmem>>, vector<8x128xf32>
    %246 = arith.mulf %236, %245 : vector<8x128xf32>
    %247 = arith.mulf %230, %238 : vector<8x128xf32>
    %248 = arith.addf %246, %247 : vector<8x128xf32>
    %249 = math.tanh %248 : vector<8x128xf32>
    %250 = arith.mulf %244, %249 : vector<8x128xf32>
    %c0_114 = arith.constant 0 : index
    %c0_115 = arith.constant 0 : index
    %251 = vector.load %arg6[%c0_114, %c0_115] : memref<8x128xf32, #tpu.memory_space<vmem>>, vector<8x128xf32>
    tpu.vector_store %arg6[%c0_114, %c0_115], %248 {strides = array<i32>} : memref<8x128xf32, #tpu.memory_space<vmem>>, vector<8x128xf32>,
    %c0_116 = arith.constant 0 : index
    %c0_117 = arith.constant 0 : index
    %252 = vector.load %arg5[%c0_116, %c0_117] : memref<8x128xf32, #tpu.memory_space<vmem>>, vector<8x128xf32>
    tpu.vector_store %arg5[%c0_116, %c0_117], %250 {strides = array<i32>} : memref<8x128xf32, #tpu.memory_space<vmem>>, vector<8x128xf32>,
    %c6_118 = arith.constant 6 : index
    %c0_119 = arith.constant 0 : index
    %c0_120 = arith.constant 0 : index
    %253 = vector.load %arg4[%c6_118, %c0_119, %c0_120] : memref<8x8x128xf32, #tpu.memory_space<vmem>>, vector<1x8x128xf32>
    %254 = vector.shape_cast %253 : vector<1x8x128xf32> to vector<8x128xf32>
    %255 = vector.shape_cast %250 : vector<8x128xf32> to vector<1x8x128xf32>
    tpu.vector_store %arg4[%c6_118, %c0_119, %c0_120], %255 {strides = array<i32>} : memref<8x8x128xf32, #tpu.memory_space<vmem>>, vector<1x8x128xf32>,
    %c7 = arith.constant 7 : index
    %c0_121 = arith.constant 0 : index
    %c0_122 = arith.constant 0 : index
    %256 = vector.load %arg2[%c7, %c0_121, %c0_122] : memref<8x8x512xf32, #tpu.memory_space<vmem>>, vector<1x8x512xf32>
    %257 = vector.shape_cast %256 : vector<1x8x512xf32> to vector<8x512xf32>
    %c0_123 = arith.constant 0 : index
    %c0_124 = arith.constant 0 : index
    %258 = vector.load %arg5[%c0_123, %c0_124] : memref<8x128xf32, #tpu.memory_space<vmem>>, vector<8x128xf32>
    %cst_125 = arith.constant dense<0.000000e+00> : vector<8x512xf32>
    %259 = tpu.matmul %258, %3, %cst_125 {dimension_numbers = #tpu.dot_dimension_numbers<[1], [0], [0], [1], [0, 0, 1, 1], [], []>} : vector<8x128xf32>, vector<128x512xf32>, vector<8x512xf32> -> vector<8x512xf32>
    %260 = arith.addf %257, %259 : vector<8x512xf32>
    %261 = vector.extract_strided_slice %260 {offsets = [0, 0], sizes = [8, 128], strides = [1, 1]} : vector<8x512xf32> to vector<8x128xf32>
    %262 = arith.negf %261 : vector<8x128xf32>
    %263 = math.exp %262 : vector<8x128xf32>
    %cst_126 = arith.constant 1.000000e+00 : f32
    %264 = vector.broadcast %cst_126 : f32 to vector<8x128xf32>
    %265 = arith.addf %264, %263 : vector<8x128xf32>
    %266 = arith.divf %264, %265 : vector<8x128xf32>
    %267 = vector.extract_strided_slice %260 {offsets = [0, 128], sizes = [8, 128], strides = [1, 1]} : vector<8x512xf32> to vector<8x128xf32>
    %268 = arith.negf %267 : vector<8x128xf32>
    %269 = math.exp %268 : vector<8x128xf32>
    %cst_127 = arith.constant 1.000000e+00 : f32
    %270 = vector.broadcast %cst_127 : f32 to vector<8x128xf32>
    %271 = arith.addf %270, %269 : vector<8x128xf32>
    %272 = arith.divf %270, %271 : vector<8x128xf32>
    %273 = vector.extract_strided_slice %260 {offsets = [0, 256], sizes = [8, 128], strides = [1, 1]} : vector<8x512xf32> to vector<8x128xf32>
    %274 = math.tanh %273 : vector<8x128xf32>
    %275 = vector.extract_strided_slice %260 {offsets = [0, 384], sizes = [8, 128], strides = [1, 1]} : vector<8x512xf32> to vector<8x128xf32>
    %276 = arith.negf %275 : vector<8x128xf32>
    %277 = math.exp %276 : vector<8x128xf32>
    %cst_128 = arith.constant 1.000000e+00 : f32
    %278 = vector.broadcast %cst_128 : f32 to vector<8x128xf32>
    %279 = arith.addf %278, %277 : vector<8x128xf32>
    %280 = arith.divf %278, %279 : vector<8x128xf32>
    %c0_129 = arith.constant 0 : index
    %c0_130 = arith.constant 0 : index
    %281 = vector.load %arg6[%c0_129, %c0_130] : memref<8x128xf32, #tpu.memory_space<vmem>>, vector<8x128xf32>
    %282 = arith.mulf %272, %281 : vector<8x128xf32>
    %283 = arith.mulf %266, %274 : vector<8x128xf32>
    %284 = arith.addf %282, %283 : vector<8x128xf32>
    %285 = math.tanh %284 : vector<8x128xf32>
    %286 = arith.mulf %280, %285 : vector<8x128xf32>
    %c0_131 = arith.constant 0 : index
    %c0_132 = arith.constant 0 : index
    %287 = vector.load %arg6[%c0_131, %c0_132] : memref<8x128xf32, #tpu.memory_space<vmem>>, vector<8x128xf32>
    tpu.vector_store %arg6[%c0_131, %c0_132], %284 {strides = array<i32>} : memref<8x128xf32, #tpu.memory_space<vmem>>, vector<8x128xf32>,
    %c0_133 = arith.constant 0 : index
    %c0_134 = arith.constant 0 : index
    %288 = vector.load %arg5[%c0_133, %c0_134] : memref<8x128xf32, #tpu.memory_space<vmem>>, vector<8x128xf32>
    tpu.vector_store %arg5[%c0_133, %c0_134], %286 {strides = array<i32>} : memref<8x128xf32, #tpu.memory_space<vmem>>, vector<8x128xf32>,
    %c7_135 = arith.constant 7 : index
    %c0_136 = arith.constant 0 : index
    %c0_137 = arith.constant 0 : index
    %289 = vector.load %arg4[%c7_135, %c0_136, %c0_137] : memref<8x8x128xf32, #tpu.memory_space<vmem>>, vector<1x8x128xf32>
    %290 = vector.shape_cast %289 : vector<1x8x128xf32> to vector<8x128xf32>
    %291 = vector.shape_cast %286 : vector<8x128xf32> to vector<1x8x128xf32>
    tpu.vector_store %arg4[%c7_135, %c0_136, %c0_137], %291 {strides = array<i32>} : memref<8x8x128xf32, #tpu.memory_space<vmem>>, vector<1x8x128xf32>,
    return
  }
  func.func @transform_0(%arg0: i32, %arg1: i32) -> (i32, i32, i32) {
    %c0_i32 = arith.constant 0 : i32
    %c0_i32_0 = arith.constant 0 : i32
    return %arg1, %arg0, %c0_i32 : i32, i32, i32
  }
  func.func @transform_1(%arg0: i32, %arg1: i32) -> (i32, i32) {
    %c0_i32 = arith.constant 0 : i32
    %c0_i32_0 = arith.constant 0 : i32
    %c0_i32_1 = arith.constant 0 : i32
    return %c0_i32, %c0_i32_0 : i32, i32
  }
  func.func @transform_2(%arg0: i32, %arg1: i32) -> (i32, i32, i32) {
    %c0_i32 = arith.constant 0 : i32
    %c0_i32_0 = arith.constant 0 : i32
    return %arg1, %arg0, %c0_i32 : i32, i32, i32
  }
}

</mosaic_0001>

<bundles_post_ra>
// kernel: tpu_custom_call.1
= control target key start
LH: loop header
LB: loop body
LE: loop exit
PB: predicated region body
PF: predicated region fallthrough
CT: control target
= control target key end

     0   :  { %s3485_s0 = inlined_call_operand.hbm [shape: f32[16,16,512], index: 0, kind: input, shape index: {}]   ;;  %s3486_s1 = inlined_call_operand.hbm [shape: f32[128,512], index: 1, kind: input, shape index: {}]   ;;  %s3487_s2 = inlined_call_operand.hbm [shape: f32[16,16,128], index: 2, kind: output, shape index: {}]  }
   0x1   :  { %3499 = sst [smem:[#allocation16_spill]] %s3486_s1 }
   0x2   :  { %7 = vsyncpa [#allocation5], 0 }
   0x3   :  { %9 = vsyncpa [#allocation5 + $0x1], 0 }
   0x4   :  { %10 = vsyncpa [#allocation8], 0 }
   0x5   :  { %11 = vsyncpa [#allocation6], 0 }
   0x6   :  { %13 = vsyncpa [#allocation6 + $0x1], 0  ;;  %s2836_s9 = smov 0   ;;  %s2838_s10 = smov 0  }
   0x7   :  { %s2840_s11 = smov 0   ;;  %s2842_s12 = smov 0  }
   0x8   :  { %s2844_s13 = smov 0   ;;  %s2846_s14 = smov 0  }
   0x9   :  { %s2848_s15 = smov 0   ;;  %s2850_s16 = smov 0  }
   0xa LB: > { %3500 = sst [smem:[#allocation13_spill]] %s2800_s14  ;;  %s1829_s17 = sadd.s32 4294967295, %s2808_s16   ;;  %s2808_s16 = sphi %s2850_s16, %s19_s16   ;;  %s2804_s15 = sphi %s2848_s15, %s3529_s15   ;;  %s2800_s14 = sphi %s2846_s14, %s3528_s14   ;;  %s2796_s13 = sphi %s2844_s13, %s3527_s13   ;;  %s2792_s12 = sphi %s2842_s12, %s3522_s12   ;;  %s2788_s11 = sphi %s2840_s11, %s3526_s11   ;;  %s2784_s10 = sphi %s2838_s10, %s3525_s10   ;;  %s2780_s9 = sphi %s2836_s9, %s3524_s9  }
   0xb   : > { %s1830_s18 = sadd.s32 4294967294, %s2808_s16   ;;  %p47_p0 = scmp.ne.s32.totalorder %s2788_s11, %s2784_s10 }
   0xc   : > { %p48_p1 = scmp.eq.s32.totalorder %s2808_s16, 0  ;;  %p53_p2 = scmp.ne.s32.totalorder %s2784_s10, %s2780_s9 }
   0xd   : > { %p2884_p3 = scmp.eq.s32.totalorder %s1829_s17, 0  ;;  %p100_p4 = scmp.eq.s32.totalorder %s1829_s17, 3 }
   0xe   : > { %p2888_p5 = por %p48_p1, %p47_p0  ;;  %p106_p6 = scmp.eq.s32.totalorder %s1830_s18, 3 }
   0xf   : > { %s3501_s20 = scalar_select %p2884_p3, 1, 0 }
  0x10   : > { %p2894_p7 = por %p2884_p3, %p53_p2  ;;  %p2898_p8 = por %p100_p4, %p47_p0 }
  0x11   : > { %p2902_p9 = por %p106_p6, %p53_p2  ;;  %p1831_p10 = scmp.ge.s32.totalorder %s2808_s16, 1 }
  0x12   : > { %s3503_s22 = scalar_select %p2894_p7, 1, 0 }
  0x13   : > { %s3504_s23 = scalar_select %p2898_p8, 1, 0 }
  0x14   : > { %s3505_s24 = scalar_select %p2902_p9, 1, 0 }
  0x15   : > { %p113_p11 = scmp.lt.s32.totalorder %s2808_s16, 5  ;;  %s2810_s26 = smov [#allocation7]  }
  0x16   : > { %3506 = sst [smem:[#allocation14_spill]] %s3505_s24  ;;  %s125_s27 = sshll.u32 %s2810_s26, 4  ;;  %s126_s27 = int_to_ptr.vmem [resolvable:$true] %s125_s27 }
  0x17   : > { %p2908_p12 = pnand %p1831_p10, %p113_p11  ;;  %p2444_p0 = scmp.lt.s32.totalorder %s2808_s16, 4 }
  0x18   : > { %s3510_s1 = sld [smem:[#allocation16_spill]] }
  0x19   : > { %s3507_s25 = scalar_select %p2908_p12, 1, 0 }
  0x1a   : > { %p2431_p13 = pneg %p2908_p12  ;;  %p2923_p2 = pnand %p2444_p0, %p2888_p5 }
  0x1c   : > { %p2917_p1 = pnand %p2431_p13, %p2884_p3 }
  0x1d   : > { %s3509_s29 = scalar_select %p2923_p2, 1, 0 }
  0x1e   : > { %s2648_s4 = scalar_lea.hbm %s3510_s1, 8192  ;;  %p2650_p6 = pneg %p2917_p1 }
  0x1f   : > { %p2649_p4 = scmp.ne.s32.totalorder %s3510_s1, %s2648_s4  ;;  %p2655_p13 = scmp.lt.u32.totalorder %s2648_s4, %s3510_s1 }
  0x21   : > { %p2651_p10 = pnand %p2650_p6, %p2649_p4 }
  0x23   : > { %p2652_p11 = pneg %p2651_p10 }
  0x25   : > { %p2657_p5 = pnand %p2655_p13, %p2652_p11 }
  0x27   : > { %2660 = shalt.err (!%p2657_p5)
}
  0x28   : > { %s2661_s17 = scalar_lea.vmem %s126_s27, 8192  ;;  %p2669_p3 = scmp.lt.s32.totalorder %s126_s27, %s126_s27 }
  0x29   : > { %p2662_p0 = scmp.ne.s32.totalorder %s126_s27, %s2661_s17  ;;  %p2670_p7 = scmp.lt.s32.totalorder %s2661_s17, %s2661_s17 }
  0x2b   : > { %p2664_p9 = pnand %p2662_p0, %p2650_p6  ;;  %p2671_p12 = por %p2670_p7, %p2669_p3 }
  0x2d   : > { %p2665_p8 = pneg %p2664_p9 }
  0x2f   : > { %p2672_p2 = pnand %p2671_p12, %p2665_p8 }
  0x31   : > { %2675 = shalt.err (!%p2672_p2)
}
  0x32   : > { %s3494_s18 = smov 512   ;;  %s3495_s21 = smov 32  }
  0x33   : > { %2434 = dma.hbm_to_vmem [thread:$0]  (!%p2917_p1), %s3510_s1, 8192, %s126_s27, [#allocation8], %s3494_s18, %s3494_s18, %s3495_s21  }
  0x34   : > { %s28_s3 = sadd.s32 1, %s2800_s14  ;;  %s31_s4 = sadd.s32 1, %s2804_s15 }
  0x35   : > { %p29_p3 = scmp.ge.s32.totalorder %s28_s3, 2  ;;  %s139_s5 = sand.u32 1, %s2788_s11  }
  0x36   : > { %s1836_s6 = sshll.u32 %s2804_s15, 2  ;;  %s1834_s7 = sshll.u32 %s139_s5, 8 }
  0x37   : > { %s3531_s3 = smov (%p29_p3, %s28_s3), 0  ;;  %s3533_s4 = smov (!%p29_p3, %s31_s4), %s2804_s15 }
  0x38   : > { %3511 = sst [smem:[#allocation15_spill]] %s3531_s3  ;;  %s35_s28 = ssub.s32 %s2800_s14, %s3531_s3 }
  0x39   : > { %p33_p7 = scmp.ge.s32.totalorder %s3533_s4, 2  ;;  %s1909_s8 = sshll.u32 %s2800_s14, 6 }
  0x3a   : > { %s150_s27 = sadd.s32 %s1909_s8, %s1836_s6  ;;  %s143_s17 = scalar_lea.vmem [#allocation4], %s1834_s7 }
  0x3b   : > { %s3535_s4 = smov (%p33_p7, %s3533_s4), 0  ;;  %s153_s26 = sshll.u32 %s143_s17, 4  ;;  %s2965_s26 = int_to_ptr.vmem [resolvable:$true] %s153_s26 }
  0x3c   : > { %s36_s30 = ssub.s32 %s2804_s15, %s3535_s4  ;;  %s1838_s18 = sshll.u32 %s150_s27, 7 }
  0x3d   : > { %s37_s21 = sor.u32 %s36_s30, %s35_s28  ;;  %s2963_s24 = scalar_lea.hbm %s3485_s0, %s1838_s18 }
  0x3e   : > { %p38_p8 = scmp.eq.s32.totalorder %s37_s21, 0  ;;  %s3512_s3 = sadd.s32 1, %s2788_s11 }
  0x3f   : > { %s2972_s6 = scalar_lea.sflag [#allocation5], %s139_s5  ;;  %s2676_s7 = scalar_lea.hbm %s2963_s24, 4096 }
  0x40   : > { %s2970_s14 = scalar_select %p38_p8, %s2788_s11, %s3512_s3  }
  0x41   : > { %p2677_p9 = scmp.ne.s32.totalorder %s2963_s24, %s2676_s7  ;;  %p3513_p12 = scmp.ne.s32.totalorder %s3509_s29, 0 }
  0x42   : > { %s2681_s18 = scalar_lea.hbm %s3485_s0, 16384  ;;  %p2682_p6 = scmp.lt.u32.totalorder %s2963_s24, %s3485_s0 }
  0x43   : > { %p2678_p1 = pneg %p3513_p12  ;;  %p2683_p10 = scmp.lt.u32.totalorder %s2681_s18, %s2676_s7 }
  0x44   : > { %p2685_p13 = scmp.lt.u32.totalorder %s2676_s7, %s2963_s24 }
  0x45   : > { %p2679_p2 = pnand %p2678_p1, %p2677_p9  ;;  %p2684_p11 = por %p2683_p10, %p2682_p6 }
  0x47   : > { %p2680_p4 = pneg %p2679_p2  ;;  %p2686_p5 = por %p2685_p13, %p2684_p11 }
  0x49   : > { %p2687_p0 = pnand %p2686_p5, %p2680_p4 }
  0x4b   : > { %2690 = shalt.err (!%p2687_p0)
}
  0x4c   : > { %s2691_s3 = scalar_lea.vmem %s2965_s26, 4096  ;;  %s2813_s5 = smov [#allocation4]  }
  0x4d   : > { %p2692_p3 = scmp.ne.s32.totalorder %s2965_s26, %s2691_s3  ;;  %s2696_s8 = sshll.u32 %s2813_s5, 4  ;;  %s2697_s8 = int_to_ptr.vmem [resolvable:$false] %s2696_s8 }
  0x4e   : > { %s2698_s27 = scalar_lea.vmem %s2697_s8, 8192  ;;  %p2699_p9 = scmp.lt.s32.totalorder %s2965_s26, %s2697_s8 }
  0x4f   : > { %p2694_p7 = pnand %p2692_p3, %p2678_p1  ;;  %p2700_p2 = scmp.lt.s32.totalorder %s2698_s27, %s2691_s3 }
  0x51   : > { %p2695_p8 = pneg %p2694_p7  ;;  %p2701_p6 = por %p2700_p2, %p2699_p9 }
  0x53   : > { %p2702_p10 = pnand %p2701_p6, %p2695_p8 }
  0x55   : > { %2705 = shalt.err (!%p2702_p10)
}
  0x56   : > { %s2814_s17 = smov 1024   ;;  %s3514_s30 = smov 32  }
  0x57   : > { %s3515_s7 = smov 512   ;;  %p3516_p1 = scmp.ne.s32.totalorder %s3507_s25, 0 }
  0x58   : > { %2438 = dma.hbm_to_vmem [thread:$0]  (!%p3513_p12), %s2963_s24, 4096, %s2965_s26, %s2972_s6, %s2814_s17, %s3515_s7, %s3514_s30  }
  0x59   : > { %165 = sbr.rel (%p3516_p1) target bundleno = 2225 (0x8b1), region = 28  ;;  %s3005_s1 = sand.u32 (!%p3516_p1), 1, %s2784_s10  }
  0x5a   : > { %s1840_s19 = sshll.u32 (!%p3516_p1), %s3005_s1, 8  ;;  %s168_s18 = scalar_lea.sflag (!%p3516_p1), [#allocation5], %s3005_s1 }
  0x5b   : > { %s3009_s21 = scalar_lea.vmem (!%p3516_p1), [#allocation4], %s1840_s19  ;;  %p3517_p4 = scmp.ne.s32.totalorder (!%p3516_p1), %s3503_s22, 0 }
  0x60   : > { %2767 = dma.done.wait (%p3517_p4), %s168_s18, 4096  }
  0x61   : > { %2769 = vsyncadd (%p3517_p4), %s168_s18, 4294963200  ;;  %p3518_p12 = scmp.ne.s32.totalorder %s3501_s20, 0 }
  0x63   : > { %2771 = dma.done.wait (%p3518_p12), [#allocation8], 8192  }
  0x64   : > { %2773 = vsyncadd (%p3518_p12), [#allocation8], 4294959104  ;;  %s1842_s24 = sshll.u32 %s3005_s1, 6  ;;  %p1843_p11 = scmp.ne.s32.totalorder %s2792_s12, 0 }
  0x65   : > { %s3020_s25 = scalar_lea.vmem [#allocation9], %s1842_s24  ;;  %v2815_v0 = vmov (!%p1843_p11), 0.0  }
  0x66   : > { %201 = sbr.rel (%p1843_p11) target bundleno = 109 (0x6d), region = 40  ;;  %202 = vst [vmem:[#allocation2] sm:$0xff] (!%p1843_p11), %v2815_v0  ;;  %203 = vst [vmem:[#allocation3] sm:$0xff] (!%p1843_p11), %v2815_v0 }
  0x6d PF: > { %v205_v1 = vld [vmem:[#allocation7 + $0x8] sm:$0xff]  ;;  %v204_v3 = vld [vmem:[#allocation7] sm:$0xff]  ;;  %v2816_v8 = vmov 0.0   ;;  %v207_v20 = vld [vmem:[#allocation7 + $0x18] sm:$0xff]  ;;  %s1910_s20 = sshll.u32 %s2792_s12, 4  ;;  %s1730_s26 = sshll.u32 %s3020_s25, 4  ;;  %s3430_s26 = int_to_ptr.vmem [resolvable:$true] %s1730_s26 }
  0x6e   : > { %v209_v2 = vld [vmem:[#allocation7 + $0x28] sm:$0xff]  ;;  %v208_v5 = vld [vmem:[#allocation7 + $0x20] sm:$0xff]  ;;  %337 = vmatprep.mubr.f32.mxu0 %v2816_v8  ;;  %408 = vmatprep.mubr.f32.mxu1 %v2816_v8  ;;  %v211_v21 = vld [vmem:[#allocation7 + $0x38] sm:$0xff]  ;;  %s1727_s22 = sadd.s32 %s2796_s13, %s1910_s20  ;;  %s1715_s5 = scalar_lea.sflag [#allocation6], %s3005_s1 }
  0x6f   : > { %v3023_v4 = vpack.c.bf16 %v209_v2, %v205_v1  ;;  %v213_v6 = vld [vmem:[#allocation7 + $0x48] sm:$0xff]  ;;  %v3027_v9 = vpack.c.bf16 %v208_v5, %v204_v3  ;;  %v212_v11 = vld [vmem:[#allocation7 + $0x40] sm:$0xff]  ;;  %v3038_v23 = vpack.c.bf16 %v211_v21, %v207_v20  ;;  %v206_v24 = vld [vmem:[#allocation7 + $0x10] sm:$0xff]  ;;  %s1906_s29 = sshll.u32 %s1727_s22, 7  ;;  %s2706_s12 = scalar_lea.vmem %s3430_s26, 1024 }
  0x70   : > { %v217_v7 = vld [vmem:[#allocation7 + $0x68] sm:$0xff]  ;;  %v216_v12 = vld [vmem:[#allocation7 + $0x60] sm:$0xff]  ;;  %v210_v25 = vld [vmem:[#allocation7 + $0x30] sm:$0xff]  ;;  %s3428_s3 = scalar_lea.hbm %s3487_s2, %s1906_s29  ;;  %p2707_p13 = scmp.ne.s32.totalorder %s3430_s26, %s2706_s12 }
  0x71   : > { %v3029_v10 = vpack.c.bf16 %v217_v7, %v213_v6  ;;  %v221_v13 = vld [vmem:[#allocation7 + $0x88] sm:$0xff]  ;;  %1912 = vmatprep.subr.bf16.mxu0 %v3023_v4  ;;  %v3033_v15 = vpack.c.bf16 %v216_v12, %v212_v11  ;;  %v220_v16 = vld [vmem:[#allocation7 + $0x80] sm:$0xff]  ;;  %v3040_v26 = vpack.c.bf16 %v210_v25, %v206_v24  ;;  %1944 = vmatprep.subr.bf16.mxu1 %v3038_v23  ;;  %v215_v28 = vld [vmem:[#allocation7 + $0x58] sm:$0xff]  ;;  %p3519_p5 = scmp.ne.s32.totalorder %s3504_s23, 0  ;;  %s2817_s13 = smov [#allocation9]  }
  0x72   : > { %v225_v14 = vld [vmem:[#allocation7 + $0xa8] sm:$0xff]  ;;  %1914 = vmatpush1.bf16.msra.mxu0 %v3027_v9  ;;  %v224_v17 = vld [vmem:[#allocation7 + $0xa0] sm:$0xff]  ;;  %v219_v29 = vld [vmem:[#allocation7 + $0x78] sm:$0xff]  ;;  %s2710_s8 = sshll.u32 %s2817_s13, 4  ;;  %s2711_s8 = int_to_ptr.vmem [resolvable:$false] %s2710_s8 }
  0x73   : > { %1916 = vmatprep.subr.bf16.mxu0 %v3029_v10  ;;  %v3036_v18 = vpack.c.bf16 %v225_v14, %v221_v13  ;;  %v229_v19 = vld [vmem:[#allocation7 + $0xc8] sm:$0xff]  ;;  %v3043_v27 = vpack.c.bf16 %v224_v17, %v220_v16  ;;  %v214_v30 = vld [vmem:[#allocation7 + $0x50] sm:$0xff]  ;;  %v228_v32 = vld [vmem:[#allocation7 + $0xc0] sm:$0xff]  ;;  %1946 = vmatpush1.bf16.msra.mxu1 %v3040_v26  ;;  %v3050_v34 = vpack.c.bf16 %v219_v29, %v215_v28  ;;  %p2708_p0 = pnand %p2707_p13, %p3519_p5  ;;  %s2712_s27 = scalar_lea.vmem %s2711_s8, 2048 }
  0x74   : > { %v233_v22 = vld [vmem:[#allocation7 + $0xe8] sm:$0xff]  ;;  %v232_v33 = vld [vmem:[#allocation7 + $0xe0] sm:$0xff]  ;;  %v218_v35 = vld [vmem:[#allocation7 + $0x70] sm:$0xff]  ;;  %p2713_p7 = scmp.lt.s32.totalorder %s3430_s26, %s2711_s8  ;;  %p2714_p8 = scmp.lt.s32.totalorder %s2712_s27, %s2706_s12 }
  0x75   : > { %v3047_v31 = vpack.c.bf16 %v233_v22, %v229_v19  ;;  %v237_v36 = vld [vmem:[#allocation7 + $0x108] sm:$0xff]  ;;  %v3052_v38 = vpack.c.bf16 %v218_v35, %v214_v30  ;;  %v223_v39 = vld [vmem:[#allocation7 + $0x98] sm:$0xff]  ;;  %1948 = vmatprep.subr.bf16.mxu1 %v3050_v34  ;;  %v222_v41 = vld [vmem:[#allocation7 + $0x90] sm:$0xff]  ;;  %v3056_v43 = vpack.c.bf16 %v232_v33, %v228_v32  ;;  %p2709_p3 = pneg %p2708_p0 }
  0x76   : > { %1918 = vmatpush1.bf16.msra.mxu0 %v3033_v15  ;;  %v241_v37 = vld [vmem:[#allocation7 + $0x128] sm:$0xff]  ;;  %v227_v40 = vld [vmem:[#allocation7 + $0xb8] sm:$0xff]  ;;  %v226_v42 = vld [vmem:[#allocation7 + $0xb0] sm:$0xff]  ;;  %p2715_p9 = por %p2714_p8, %p2713_p7 }
  0x77   : > { %1920 = vmatprep.subr.bf16.mxu0 %v3036_v18  ;;  %v236_v44 = vld [vmem:[#allocation7 + $0x100] sm:$0xff]  ;;  %v3058_v46 = vpack.c.bf16 %v227_v40, %v223_v39  ;;  %v3061_v47 = vpack.c.bf16 %v241_v37, %v237_v36  ;;  %1950 = vmatpush1.bf16.msra.mxu1 %v3052_v38  ;;  %v245_v48 = vld [vmem:[#allocation7 + $0x148] sm:$0xff]  ;;  %v3064_v49 = vpack.c.bf16 %v226_v42, %v222_v41  ;;  %v231_v50 = vld [vmem:[#allocation7 + $0xd8] sm:$0xff] }
  0x78   : > { %v240_v45 = vld [vmem:[#allocation7 + $0x120] sm:$0xff]  ;;  %v235_v51 = vld [vmem:[#allocation7 + $0xf8] sm:$0xff]  ;;  %v249_v52 = vld [vmem:[#allocation7 + $0x168] sm:$0xff]  ;;  %p2716_p2 = pnand %p2715_p9, %p2709_p3 }
  0x79   : > { %1952 = vmatprep.subr.bf16.mxu1 %v3058_v46  ;;  %v3067_v53 = vpack.c.bf16 %v235_v51, %v231_v50  ;;  %v230_v54 = vld [vmem:[#allocation7 + $0xd0] sm:$0xff]  ;;  %v3070_v56 = vpack.c.bf16 %v240_v45, %v236_v44  ;;  %v239_v57 = vld [vmem:[#allocation7 + $0x118] sm:$0xff]  ;;  %v3073_v59 = vpack.c.bf16 %v249_v52, %v245_v48  ;;  %v244_v60 = vld [vmem:[#allocation7 + $0x140] sm:$0xff] }
  0x7a   : > { %1922 = vmatpush1.bf16.msra.mxu0 %v3043_v27  ;;  %v234_v55 = vld [vmem:[#allocation7 + $0xf0] sm:$0xff]  ;;  %v243_v58 = vld [vmem:[#allocation7 + $0x138] sm:$0xff]  ;;  %v248_v61 = vld [vmem:[#allocation7 + $0x160] sm:$0xff] }
  0x7b   : > { %1924 = vmatprep.subr.bf16.mxu0 %v3047_v31  ;;  %1954 = vmatpush1.bf16.msra.mxu1 %v3064_v49  ;;  %v253_v62 = vld [vmem:[#allocation7 + $0x188] sm:$0xff]  ;;  %v3076_v63 = vpack.c.bf16 %v234_v55, %v230_v54  ;;  %v3079_v1 = vpack.c.bf16 %v243_v58, %v239_v57  ;;  %v238_v2 = vld [vmem:[#allocation7 + $0x110] sm:$0xff]  ;;  %v247_v5 = vld [vmem:[#allocation7 + $0x158] sm:$0xff]  ;;  %v3082_v7 = vpack.c.bf16 %v248_v61, %v244_v60 }
  0x7c   : > { %v257_v0 = vld [vmem:[#allocation7 + $0x1a8] sm:$0xff]  ;;  %1956 = vmatprep.subr.bf16.mxu1 %v3067_v53  ;;  %v242_v3 = vld [vmem:[#allocation7 + $0x130] sm:$0xff]  ;;  %v251_v6 = vld [vmem:[#allocation7 + $0x178] sm:$0xff] }
  0x7d   : > { %v3085_v11 = vpack.c.bf16 %v257_v0, %v253_v62  ;;  %v252_v12 = vld [vmem:[#allocation7 + $0x180] sm:$0xff]  ;;  %v261_v14 = vld [vmem:[#allocation7 + $0x1c8] sm:$0xff]  ;;  %v3088_v16 = vpack.c.bf16 %v242_v3, %v238_v2  ;;  %v3091_v19 = vpack.c.bf16 %v251_v6, %v247_v5  ;;  %v246_v20 = vld [vmem:[#allocation7 + $0x150] sm:$0xff] }
  0x7e   : > { %1926 = vmatpush1.bf16.msra.mxu0 %v3056_v43  ;;  %v256_v13 = vld [vmem:[#allocation7 + $0x1a0] sm:$0xff]  ;;  %v265_v17 = vld [vmem:[#allocation7 + $0x1e8] sm:$0xff]  ;;  %v250_v21 = vld [vmem:[#allocation7 + $0x170] sm:$0xff] }
  0x7f   : > { %1928 = vmatprep.subr.bf16.mxu0 %v3061_v47  ;;  %1958 = vmatpush1.bf16.msra.mxu1 %v3076_v63  ;;  %v255_v22 = vld [vmem:[#allocation7 + $0x198] sm:$0xff]  ;;  %v3094_v25 = vpack.c.bf16 %v256_v13, %v252_v12  ;;  %v3097_v28 = vpack.c.bf16 %v265_v17, %v261_v14  ;;  %v260_v29 = vld [vmem:[#allocation7 + $0x1c0] sm:$0xff]  ;;  %v3100_v32 = vpack.c.bf16 %v250_v21, %v246_v20  ;;  %v254_v35 = vld [vmem:[#allocation7 + $0x190] sm:$0xff] }
  0x80   : > { %1960 = vmatprep.subr.bf16.mxu1 %v3079_v1  ;;  %v259_v24 = vld [vmem:[#allocation7 + $0x1b8] sm:$0xff]  ;;  %v264_v30 = vld [vmem:[#allocation7 + $0x1e0] sm:$0xff]  ;;  %v258_v36 = vld [vmem:[#allocation7 + $0x1b0] sm:$0xff] }
  0x81   : > { %v3103_v33 = vpack.c.bf16 %v259_v24, %v255_v22  ;;  %v263_v37 = vld [vmem:[#allocation7 + $0x1d8] sm:$0xff]  ;;  %v3106_v40 = vpack.c.bf16 %v264_v30, %v260_v29  ;;  %v3110_v41 = vpack.c.bf16 %v258_v36, %v254_v35  ;;  %v262_v44 = vld [vmem:[#allocation7 + $0x1d0] sm:$0xff]  ;;  %v268_v51 = vld [vmem:[%s3009_s21] sm:$0xff] }
  0x82   : > { %1930 = vmatpush1.bf16.msra.mxu0 %v3070_v56  ;;  %v267_v39 = vld [vmem:[#allocation7 + $0x1f8] sm:$0xff]  ;;  %v266_v45 = vld [vmem:[#allocation7 + $0x1f0] sm:$0xff]  ;;  %v269_v52 = vld [vmem:[%s3009_s21 + $0x8] sm:$0xff] }
  0x83   : > { %1932 = vmatprep.subr.bf16.mxu0 %v3073_v59  ;;  %1962 = vmatpush1.bf16.msra.mxu1 %v3088_v16  ;;  %v3113_v42 = vpack.c.bf16 %v267_v39, %v263_v37  ;;  %v272_v48 = vld [vmem:[#allocation2] sm:$0xff]  ;;  %v3117_v50 = vpack.c.bf16 %v266_v45, %v262_v44  ;;  %v271_v62 = vld [vmem:[%s3009_s21 + $0x18] sm:$0xff] }
  0x84   : > { %1964 = vmatprep.subr.bf16.mxu1 %v3091_v19  ;;  %v270_v5 = vld [vmem:[%s3009_s21 + $0x10] sm:$0xff]  ;;  %v438_v24 = vld [vmem:[#allocation3] sm:$0xff] }
  0x86   : > { %1934 = vmatpush1.bf16.msra.mxu0 %v3082_v7 }
  0x87   : > { %1936 = vmatprep.subr.bf16.mxu0 %v3085_v11  ;;  %1966 = vmatpush1.bf16.msra.mxu1 %v3100_v32 }
  0x88   : > { %1968 = vmatprep.subr.bf16.mxu1 %v3103_v33 }
  0x8a   : > { %1938 = vmatpush1.bf16.msra.mxu0 %v3094_v25 }
  0x8b   : > { %1940 = vmatprep.subr.bf16.mxu0 %v3097_v28  ;;  %1970 = vmatpush1.bf16.msra.mxu1 %v3110_v41 }
  0x8c   : > { %1972 = vmatprep.subr.bf16.mxu1 %v3113_v42 }
  0x8e   : > { %1942 = vmatpush1.bf16.msra.mxu0 %v3106_v40 }
  0x8f   : > { %1976 = vmatprep.subr.bf16.mxu0 %v3023_v4  ;;  %1974 = vmatpush1.bf16.msra.mxu1 %v3117_v50 }
  0x90   : > { %2008 = vmatprep.subr.bf16.mxu1 %v3038_v23 }
  0x91   : > { %338 = vmatmul.mubr.f32.vlgmr.msra.gmra.mrb[0].mxu0 %v272_v48 }
  0x92   : > { %1978 = vmatpush1.bf16.msra.mxu0 %v3027_v9  ;;  %517 = vmatprep.mubr.f32.mxu0 %v2816_v8 }
  0x93   : > { %1980 = vmatprep.subr.bf16.mxu0 %v3029_v10  ;;  %409 = vmatmul.mubr.f32.vlgmr.msra.gmra.mrb[0].mxu1 %v272_v48 }
  0x94   : > { %2010 = vmatpush1.bf16.msra.mxu1 %v3040_v26  ;;  %588 = vmatprep.mubr.f32.mxu1 %v2816_v8 }
  0x95   : > { %2012 = vmatprep.subr.bf16.mxu1 %v3050_v34 }
  0x96   : > { %1982 = vmatpush1.bf16.msra.mxu0 %v3033_v15 }
  0x97   : > { %1984 = vmatprep.subr.bf16.mxu0 %v3036_v18 }
  0x98   : > { %2014 = vmatpush1.bf16.msra.mxu1 %v3052_v38 }
  0x99   : > { %2016 = vmatprep.subr.bf16.mxu1 %v3058_v46 }
  0x9a   : > { %1986 = vmatpush1.bf16.msra.mxu0 %v3043_v27 }
  0x9b   : > { %1988 = vmatprep.subr.bf16.mxu0 %v3047_v31 }
  0x9c   : > { %2018 = vmatpush1.bf16.msra.mxu1 %v3064_v49 }
  0x9d   : > { %2020 = vmatprep.subr.bf16.mxu1 %v3067_v53 }
  0x9e   : > { %1990 = vmatpush1.bf16.msra.mxu0 %v3056_v43 }
  0x9f   : > { %1992 = vmatprep.subr.bf16.mxu0 %v3061_v47 }
  0xa0   : > { %2022 = vmatpush1.bf16.msra.mxu1 %v3076_v63 }
  0xa1   : > { %2024 = vmatprep.subr.bf16.mxu1 %v3079_v1 }
  0xa2   : > { %1994 = vmatpush1.bf16.msra.mxu0 %v3070_v56 }
  0xa3   : > { %1996 = vmatprep.subr.bf16.mxu0 %v3073_v59 }
  0xa4   : > { %2026 = vmatpush1.bf16.msra.mxu1 %v3088_v16 }
  0xa5   : > { %2028 = vmatprep.subr.bf16.mxu1 %v3091_v19 }
  0xa6   : > { %1998 = vmatpush1.bf16.msra.mxu0 %v3082_v7 }
  0xa7   : > { %2000 = vmatprep.subr.bf16.mxu0 %v3085_v11 }
  0xa8   : > { %2030 = vmatpush1.bf16.msra.mxu1 %v3100_v32 }
  0xa9   : > { %2032 = vmatprep.subr.bf16.mxu1 %v3103_v33 }
  0xaa   : > { %2002 = vmatpush1.bf16.msra.mxu0 %v3094_v25 }
  0xab   : > { %2004 = vmatprep.subr.bf16.mxu0 %v3097_v28 }
  0xac   : > { %2034 = vmatpush1.bf16.msra.mxu1 %v3110_v41 }
  0xad   : > { %2036 = vmatprep.subr.bf16.mxu1 %v3113_v42 }
  0xae   : > { %2006 = vmatpush1.bf16.msra.mxu0 %v3106_v40 }
  0xaf   : > { %2040 = vmatprep.subr.bf16.mxu0 %v3023_v4 }
  0xb0   : > { %2038 = vmatpush1.bf16.msra.mxu1 %v3117_v50 }
  0xb1   : > { %2072 = vmatprep.subr.bf16.mxu1 %v3038_v23 }
 0x164   : > { %v339_v54 = vpop.f32.mrb[0].mxu0 }
 0x165   : > { %v415_v55 = vadd.f32 %v339_v54, %v268_v51  ;;  %v341_v57 = vpop.f32.mrb[1].mxu0  ;;  %v1847_v51 = vld [vmem:[%s3009_s21 + $0x20] sm:$0xff] }
 0x166   : > { %v416_v58 = vadd.f32 %v341_v57, %v269_v52  ;;  %v410_v0 = vpop.f32.mrb[0].mxu1  ;;  %v1848_v52 = vld [vmem:[%s3009_s21 + $0x28] sm:$0xff] }
 0x167   : > { %v1844_v60 = vmul.f32 -1.442695, %v415_v55  ;;  %v412_v2 = vpop.f32.mrb[1].mxu1  ;;  %v417_v12 = vadd.f32 %v410_v0, %v270_v5  ;;  %v1849_v5 = vld [vmem:[%s3009_s21 + $0x30] sm:$0xff] }
 0x168   : > { %v1845_v61 = vmul.f32 -1.442695, %v416_v58  ;;  %v418_v3 = vadd.f32 %v412_v2, %v271_v62  ;;  %v1850_v2 = vld [vmem:[%s3009_s21 + $0x38] sm:$0xff] }
 0x169   : > { %2520 = vpow2.f32 %v1844_v60 }
 0x16a   : > { %2522 = vpow2.f32 %v1845_v61  ;;  %v1846_v6 = vmul.f32 -1.442695, %v418_v3 }
 0x16c   : > { %2524 = vpow2.f32 %v1846_v6 }
 0x16d   : > { %2526 = vtanh.f32 %v417_v12 }
 0x173   : > { %v2521_v13 = vpop.eup %2520 }
 0x174   : > { %v2523_v14 = vpop.eup %2522  ;;  %v422_v17 = vadd.f32 1.0, %v2521_v13 }
 0x175   : > { %v428_v20 = vadd.f32 1.0, %v2523_v14 }
 0x176   : > { %2528 = vrcp.f32 %v422_v17  ;;  %v2525_v21 = vpop.eup %2524 }
 0x177   : > { %2530 = vrcp.f32 %v428_v20  ;;  %v2527_v22 = vpop.eup %2526  ;;  %v435_v30 = vadd.f32 1.0, %v2525_v21 }
 0x179   : > { %2532 = vrcp.f32 %v435_v30 }
 0x180   : > { %v2529_v29 = vpop.eup %2528 }
 0x181   : > { %v2531_v35 = vpop.eup %2530  ;;  %v440_v36 = vmul.f32 %v2529_v29, %v2527_v22 }
 0x182   : > { %v439_v37 = vmul.f32 %v2531_v35, %v438_v24 }
 0x183   : > { %v2533_v44 = vpop.eup %2532 }
 0x184   : > { %v3161_v39 = vadd.f32 %v440_v36, %v439_v37 }
 0x186   : > { %2534 = vtanh.f32 %v3161_v39 }
 0x190   : > { %v2535_v45 = vpop.eup %2534 }
 0x191   : > { %v443_v48 = vmul.f32 %v2535_v45, %v2533_v44 }
 0x193   : > { %446 = vst [vmem:[%s3020_s25] sm:$0xff] %v443_v48  ;;  %518 = vmatmul.mubr.f32.vlgmr.msra.gmra.mrb[2].mxu0 %v443_v48  ;;  %589 = vmatmul.mubr.f32.vlgmr.msra.gmra.mrb[2].mxu1 %v443_v48 }
 0x194   : > { %2042 = vmatpush1.bf16.msra.mxu0 %v3027_v9  ;;  %2074 = vmatpush1.bf16.msra.mxu1 %v3040_v26 }
 0x195   : > { %2044 = vmatprep.subr.bf16.mxu0 %v3029_v10  ;;  %2076 = vmatprep.subr.bf16.mxu1 %v3050_v34 }
 0x196   : > { %698 = vmatprep.mubr.f32.mxu0 %v2816_v8  ;;  %769 = vmatprep.mubr.f32.mxu1 %v2816_v8 }
 0x198   : > { %2046 = vmatpush1.bf16.msra.mxu0 %v3033_v15  ;;  %2078 = vmatpush1.bf16.msra.mxu1 %v3052_v38 }
 0x199   : > { %2048 = vmatprep.subr.bf16.mxu0 %v3036_v18  ;;  %2080 = vmatprep.subr.bf16.mxu1 %v3058_v46 }
 0x19c   : > { %2050 = vmatpush1.bf16.msra.mxu0 %v3043_v27  ;;  %2082 = vmatpush1.bf16.msra.mxu1 %v3064_v49 }
 0x19d   : > { %2052 = vmatprep.subr.bf16.mxu0 %v3047_v31  ;;  %2084 = vmatprep.subr.bf16.mxu1 %v3067_v53 }
 0x1a0   : > { %2054 = vmatpush1.bf16.msra.mxu0 %v3056_v43  ;;  %2086 = vmatpush1.bf16.msra.mxu1 %v3076_v63 }
 0x1a1   : > { %2056 = vmatprep.subr.bf16.mxu0 %v3061_v47  ;;  %2088 = vmatprep.subr.bf16.mxu1 %v3079_v1 }
 0x1a4   : > { %2058 = vmatpush1.bf16.msra.mxu0 %v3070_v56  ;;  %2090 = vmatpush1.bf16.msra.mxu1 %v3088_v16 }
 0x1a5   : > { %2060 = vmatprep.subr.bf16.mxu0 %v3073_v59  ;;  %2092 = vmatprep.subr.bf16.mxu1 %v3091_v19 }
 0x1a8   : > { %2062 = vmatpush1.bf16.msra.mxu0 %v3082_v7  ;;  %2094 = vmatpush1.bf16.msra.mxu1 %v3100_v32 }
 0x1a9   : > { %2064 = vmatprep.subr.bf16.mxu0 %v3085_v11  ;;  %2096 = vmatprep.subr.bf16.mxu1 %v3103_v33 }
 0x1ac   : > { %2066 = vmatpush1.bf16.msra.mxu0 %v3094_v25  ;;  %2098 = vmatpush1.bf16.msra.mxu1 %v3110_v41 }
 0x1ad   : > { %2068 = vmatprep.subr.bf16.mxu0 %v3097_v28  ;;  %2100 = vmatprep.subr.bf16.mxu1 %v3113_v42 }
 0x1b0   : > { %2070 = vmatpush1.bf16.msra.mxu0 %v3106_v40  ;;  %2102 = vmatpush1.bf16.msra.mxu1 %v3117_v50 }
 0x1b1   : > { %2104 = vmatprep.subr.bf16.mxu0 %v3023_v4  ;;  %2136 = vmatprep.subr.bf16.mxu1 %v3038_v23 }
 0x266   : > { %v519_v54 = vpop.f32.mrb[2].mxu0  ;;  %v590_v55 = vpop.f32.mrb[2].mxu1 }
 0x267   : > { %v595_v57 = vadd.f32 %v1847_v51, %v519_v54  ;;  %v521_v58 = vpop.f32.mrb[3].mxu0  ;;  %v592_v60 = vpop.f32.mrb[3].mxu1  ;;  %v597_v12 = vadd.f32 %v1849_v5, %v590_v55  ;;  %v1856_v51 = vld [vmem:[%s3009_s21 + $0x48] sm:$0xff] }
 0x268   : > { %v596_v61 = vadd.f32 %v1848_v52, %v521_v58  ;;  %v598_v3 = vadd.f32 %v1850_v2, %v592_v60 }
 0x269   : > { %v1851_v62 = vmul.f32 -1.442695, %v595_v57 }
 0x26a   : > { %v1852_v0 = vmul.f32 -1.442695, %v596_v61  ;;  %v1853_v6 = vmul.f32 -1.442695, %v598_v3  ;;  %v1857_v3 = vld [vmem:[%s3009_s21 + $0x50] sm:$0xff] }
 0x26b   : > { %2536 = vpow2.f32 %v1851_v62 }
 0x26c   : > { %2538 = vpow2.f32 %v1852_v0  ;;  %v1858_v0 = vld [vmem:[%s3009_s21 + $0x58] sm:$0xff] }
 0x26d   : > { %2540 = vpow2.f32 %v1853_v6 }
 0x26e   : > { %2542 = vtanh.f32 %v597_v12 }
 0x275   : > { %v2537_v13 = vpop.eup %2536 }
 0x276   : > { %v2539_v14 = vpop.eup %2538  ;;  %v602_v17 = vadd.f32 1.0, %v2537_v13 }
 0x277   : > { %v608_v20 = vadd.f32 1.0, %v2539_v14  ;;  %v2541_v21 = vpop.eup %2540 }
 0x278   : > { %2544 = vrcp.f32 %v602_v17  ;;  %v2543_v22 = vpop.eup %2542  ;;  %v615_v35 = vadd.f32 1.0, %v2541_v21 }
 0x279   : > { %2546 = vrcp.f32 %v608_v20 }
 0x27a   : > { %2548 = vrcp.f32 %v615_v35 }
 0x282   : > { %v2545_v24 = vpop.eup %2544 }
 0x283   : > { %v2547_v29 = vpop.eup %2546  ;;  %v620_v30 = vmul.f32 %v2545_v24, %v2543_v22 }
 0x284   : > { %v619_v36 = vmul.f32 %v2547_v29, %v3161_v39  ;;  %v2549_v44 = vpop.eup %2548  ;;  %v1855_v39 = vld [vmem:[%s3009_s21 + $0x40] sm:$0xff] }
 0x286   : > { %v3204_v37 = vadd.f32 %v620_v30, %v619_v36 }
 0x288   : > { %2550 = vtanh.f32 %v3204_v37 }
 0x292   : > { %v2551_v45 = vpop.eup %2550 }
 0x293   : > { %v623_v48 = vmul.f32 %v2551_v45, %v2549_v44 }
 0x295   : > { %1854 = vst [vmem:[%s3020_s25 + $0x8] sm:$0xff] %v623_v48  ;;  %699 = vmatmul.mubr.f32.vlgmr.msra.gmra.mrb[4].mxu0 %v623_v48  ;;  %770 = vmatmul.mubr.f32.vlgmr.msra.gmra.mrb[4].mxu1 %v623_v48 }
 0x296   : > { %2106 = vmatpush1.bf16.msra.mxu0 %v3027_v9  ;;  %2138 = vmatpush1.bf16.msra.mxu1 %v3040_v26 }
 0x297   : > { %2108 = vmatprep.subr.bf16.mxu0 %v3029_v10  ;;  %2140 = vmatprep.subr.bf16.mxu1 %v3050_v34 }
 0x298   : > { %879 = vmatprep.mubr.f32.mxu0 %v2816_v8  ;;  %950 = vmatprep.mubr.f32.mxu1 %v2816_v8 }
 0x29a   : > { %2110 = vmatpush1.bf16.msra.mxu0 %v3033_v15  ;;  %2142 = vmatpush1.bf16.msra.mxu1 %v3052_v38 }
 0x29b   : > { %2112 = vmatprep.subr.bf16.mxu0 %v3036_v18  ;;  %2144 = vmatprep.subr.bf16.mxu1 %v3058_v46 }
 0x29e   : > { %2114 = vmatpush1.bf16.msra.mxu0 %v3043_v27  ;;  %2146 = vmatpush1.bf16.msra.mxu1 %v3064_v49 }
 0x29f   : > { %2116 = vmatprep.subr.bf16.mxu0 %v3047_v31  ;;  %2148 = vmatprep.subr.bf16.mxu1 %v3067_v53 }
 0x2a2   : > { %2118 = vmatpush1.bf16.msra.mxu0 %v3056_v43  ;;  %2150 = vmatpush1.bf16.msra.mxu1 %v3076_v63 }
 0x2a3   : > { %2120 = vmatprep.subr.bf16.mxu0 %v3061_v47  ;;  %2152 = vmatprep.subr.bf16.mxu1 %v3079_v1 }
 0x2a6   : > { %2122 = vmatpush1.bf16.msra.mxu0 %v3070_v56  ;;  %2154 = vmatpush1.bf16.msra.mxu1 %v3088_v16 }
 0x2a7   : > { %2124 = vmatprep.subr.bf16.mxu0 %v3073_v59  ;;  %2156 = vmatprep.subr.bf16.mxu1 %v3091_v19 }
 0x2aa   : > { %2126 = vmatpush1.bf16.msra.mxu0 %v3082_v7  ;;  %2158 = vmatpush1.bf16.msra.mxu1 %v3100_v32 }
 0x2ab   : > { %2128 = vmatprep.subr.bf16.mxu0 %v3085_v11  ;;  %2160 = vmatprep.subr.bf16.mxu1 %v3103_v33 }
 0x2ae   : > { %2130 = vmatpush1.bf16.msra.mxu0 %v3094_v25  ;;  %2162 = vmatpush1.bf16.msra.mxu1 %v3110_v41 }
 0x2af   : > { %2132 = vmatprep.subr.bf16.mxu0 %v3097_v28  ;;  %2164 = vmatprep.subr.bf16.mxu1 %v3113_v42 }
 0x2b2   : > { %2134 = vmatpush1.bf16.msra.mxu0 %v3106_v40  ;;  %2166 = vmatpush1.bf16.msra.mxu1 %v3117_v50 }
 0x2b3   : > { %2168 = vmatprep.subr.bf16.mxu0 %v3023_v4  ;;  %2200 = vmatprep.subr.bf16.mxu1 %v3038_v23 }
 0x368   : > { %v700_v52 = vpop.f32.mrb[4].mxu0  ;;  %v771_v54 = vpop.f32.mrb[4].mxu1 }
 0x369   : > { %v776_v55 = vadd.f32 %v1855_v39, %v700_v52  ;;  %v702_v57 = vpop.f32.mrb[5].mxu0  ;;  %v773_v58 = vpop.f32.mrb[5].mxu1  ;;  %v778_v6 = vadd.f32 %v1857_v3, %v771_v54  ;;  %v1864_v39 = vld [vmem:[%s3009_s21 + $0x68] sm:$0xff] }
 0x36a   : > { %v777_v60 = vadd.f32 %v1856_v51, %v702_v57  ;;  %v779_v2 = vadd.f32 %v1858_v0, %v773_v58 }
 0x36b   : > { %v1859_v61 = vmul.f32 -1.442695, %v776_v55 }
 0x36c   : > { %v1860_v62 = vmul.f32 -1.442695, %v777_v60  ;;  %v1861_v5 = vmul.f32 -1.442695, %v779_v2  ;;  %v1865_v2 = vld [vmem:[%s3009_s21 + $0x70] sm:$0xff] }
 0x36d   : > { %2552 = vpow2.f32 %v1859_v61 }
 0x36e   : > { %2554 = vpow2.f32 %v1860_v62  ;;  %v1866_v62 = vld [vmem:[%s3009_s21 + $0x78] sm:$0xff] }
 0x36f   : > { %2556 = vpow2.f32 %v1861_v5 }
 0x370   : > { %2558 = vtanh.f32 %v778_v6 }
 0x377   : > { %v2553_v12 = vpop.eup %2552 }
 0x378   : > { %v2555_v13 = vpop.eup %2554  ;;  %v783_v14 = vadd.f32 1.0, %v2553_v12 }
 0x379   : > { %v789_v17 = vadd.f32 1.0, %v2555_v13  ;;  %v2557_v20 = vpop.eup %2556 }
 0x37a   : > { %2560 = vrcp.f32 %v783_v14  ;;  %v2559_v21 = vpop.eup %2558  ;;  %v796_v30 = vadd.f32 1.0, %v2557_v20 }
 0x37b   : > { %2562 = vrcp.f32 %v789_v17 }
 0x37c   : > { %2564 = vrcp.f32 %v796_v30 }
 0x384   : > { %v2561_v22 = vpop.eup %2560 }
 0x385   : > { %v2563_v24 = vpop.eup %2562  ;;  %v801_v29 = vmul.f32 %v2561_v22, %v2559_v21 }
 0x386   : > { %v800_v35 = vmul.f32 %v2563_v24, %v3204_v37  ;;  %v2565_v44 = vpop.eup %2564  ;;  %v1863_v37 = vld [vmem:[%s3009_s21 + $0x60] sm:$0xff] }
 0x388   : > { %v3247_v36 = vadd.f32 %v801_v29, %v800_v35 }
 0x38a   : > { %2566 = vtanh.f32 %v3247_v36 }
 0x394   : > { %v2567_v45 = vpop.eup %2566 }
 0x395   : > { %v804_v48 = vmul.f32 %v2567_v45, %v2565_v44 }
 0x397   : > { %1862 = vst [vmem:[%s3020_s25 + $0x10] sm:$0xff] %v804_v48  ;;  %880 = vmatmul.mubr.f32.vlgmr.msra.gmra.mrb[6].mxu0 %v804_v48  ;;  %951 = vmatmul.mubr.f32.vlgmr.msra.gmra.mrb[6].mxu1 %v804_v48 }
 0x398   : > { %2170 = vmatpush1.bf16.msra.mxu0 %v3027_v9  ;;  %2202 = vmatpush1.bf16.msra.mxu1 %v3040_v26 }
 0x399   : > { %2172 = vmatprep.subr.bf16.mxu0 %v3029_v10  ;;  %2204 = vmatprep.subr.bf16.mxu1 %v3050_v34 }
 0x39a   : > { %1060 = vmatprep.mubr.f32.mxu0 %v2816_v8  ;;  %1131 = vmatprep.mubr.f32.mxu1 %v2816_v8 }
 0x39c   : > { %2174 = vmatpush1.bf16.msra.mxu0 %v3033_v15  ;;  %2206 = vmatpush1.bf16.msra.mxu1 %v3052_v38 }
 0x39d   : > { %2176 = vmatprep.subr.bf16.mxu0 %v3036_v18  ;;  %2208 = vmatprep.subr.bf16.mxu1 %v3058_v46 }
 0x3a0   : > { %2178 = vmatpush1.bf16.msra.mxu0 %v3043_v27  ;;  %2210 = vmatpush1.bf16.msra.mxu1 %v3064_v49 }
 0x3a1   : > { %2180 = vmatprep.subr.bf16.mxu0 %v3047_v31  ;;  %2212 = vmatprep.subr.bf16.mxu1 %v3067_v53 }
 0x3a4   : > { %2182 = vmatpush1.bf16.msra.mxu0 %v3056_v43  ;;  %2214 = vmatpush1.bf16.msra.mxu1 %v3076_v63 }
 0x3a5   : > { %2184 = vmatprep.subr.bf16.mxu0 %v3061_v47  ;;  %2216 = vmatprep.subr.bf16.mxu1 %v3079_v1 }
 0x3a8   : > { %2186 = vmatpush1.bf16.msra.mxu0 %v3070_v56  ;;  %2218 = vmatpush1.bf16.msra.mxu1 %v3088_v16 }
 0x3a9   : > { %2188 = vmatprep.subr.bf16.mxu0 %v3073_v59  ;;  %2220 = vmatprep.subr.bf16.mxu1 %v3091_v19 }
 0x3ac   : > { %2190 = vmatpush1.bf16.msra.mxu0 %v3082_v7  ;;  %2222 = vmatpush1.bf16.msra.mxu1 %v3100_v32 }
 0x3ad   : > { %2192 = vmatprep.subr.bf16.mxu0 %v3085_v11  ;;  %2224 = vmatprep.subr.bf16.mxu1 %v3103_v33 }
 0x3b0   : > { %2194 = vmatpush1.bf16.msra.mxu0 %v3094_v25  ;;  %2226 = vmatpush1.bf16.msra.mxu1 %v3110_v41 }
 0x3b1   : > { %2196 = vmatprep.subr.bf16.mxu0 %v3097_v28  ;;  %2228 = vmatprep.subr.bf16.mxu1 %v3113_v42 }
 0x3b4   : > { %2198 = vmatpush1.bf16.msra.mxu0 %v3106_v40  ;;  %2230 = vmatpush1.bf16.msra.mxu1 %v3117_v50 }
 0x3b5   : > { %2232 = vmatprep.subr.bf16.mxu0 %v3023_v4  ;;  %2264 = vmatprep.subr.bf16.mxu1 %v3038_v23 }
 0x46a   : > { %v881_v51 = vpop.f32.mrb[6].mxu0  ;;  %v952_v52 = vpop.f32.mrb[6].mxu1 }
 0x46b   : > { %v957_v54 = vadd.f32 %v1863_v37, %v881_v51  ;;  %v883_v55 = vpop.f32.mrb[7].mxu0  ;;  %v954_v57 = vpop.f32.mrb[7].mxu1  ;;  %v959_v5 = vadd.f32 %v1865_v2, %v952_v52  ;;  %v1872_v37 = vld [vmem:[%s3009_s21 + $0x88] sm:$0xff] }
 0x46c   : > { %v958_v58 = vadd.f32 %v1864_v39, %v883_v55  ;;  %v960_v0 = vadd.f32 %v1866_v62, %v954_v57 }
 0x46d   : > { %v1867_v60 = vmul.f32 -1.442695, %v957_v54 }
 0x46e   : > { %v1868_v61 = vmul.f32 -1.442695, %v958_v58  ;;  %v1869_v3 = vmul.f32 -1.442695, %v960_v0  ;;  %v1873_v0 = vld [vmem:[%s3009_s21 + $0x90] sm:$0xff] }
 0x46f   : > { %2568 = vpow2.f32 %v1867_v60 }
 0x470   : > { %2570 = vpow2.f32 %v1868_v61  ;;  %v1874_v61 = vld [vmem:[%s3009_s21 + $0x98] sm:$0xff] }
 0x471   : > { %2572 = vpow2.f32 %v1869_v3 }
 0x472   : > { %2574 = vtanh.f32 %v959_v5 }
 0x479   : > { %v2569_v6 = vpop.eup %2568 }
 0x47a   : > { %v2571_v12 = vpop.eup %2570  ;;  %v964_v13 = vadd.f32 1.0, %v2569_v6 }
 0x47b   : > { %v970_v14 = vadd.f32 1.0, %v2571_v12  ;;  %v2573_v17 = vpop.eup %2572 }
 0x47c   : > { %2576 = vrcp.f32 %v964_v13  ;;  %v2575_v20 = vpop.eup %2574  ;;  %v977_v29 = vadd.f32 1.0, %v2573_v17 }
 0x47d   : > { %2578 = vrcp.f32 %v970_v14 }
 0x47e   : > { %2580 = vrcp.f32 %v977_v29 }
 0x486   : > { %v2577_v21 = vpop.eup %2576 }
 0x487   : > { %v2579_v22 = vpop.eup %2578  ;;  %v982_v24 = vmul.f32 %v2577_v21, %v2575_v20 }
 0x488   : > { %v981_v30 = vmul.f32 %v2579_v22, %v3247_v36  ;;  %v2581_v44 = vpop.eup %2580  ;;  %v1871_v36 = vld [vmem:[%s3009_s21 + $0x80] sm:$0xff] }
 0x48a   : > { %v3290_v35 = vadd.f32 %v982_v24, %v981_v30 }
 0x48c   : > { %2582 = vtanh.f32 %v3290_v35 }
 0x496   : > { %v2583_v45 = vpop.eup %2582 }
 0x497   : > { %v985_v48 = vmul.f32 %v2583_v45, %v2581_v44 }
 0x499   : > { %1870 = vst [vmem:[%s3020_s25 + $0x18] sm:$0xff] %v985_v48  ;;  %1061 = vmatmul.mubr.f32.vlgmr.msra.gmra.mrb[8].mxu0 %v985_v48  ;;  %1132 = vmatmul.mubr.f32.vlgmr.msra.gmra.mrb[8].mxu1 %v985_v48 }
 0x49a   : > { %2234 = vmatpush1.bf16.msra.mxu0 %v3027_v9  ;;  %2266 = vmatpush1.bf16.msra.mxu1 %v3040_v26 }
 0x49b   : > { %2236 = vmatprep.subr.bf16.mxu0 %v3029_v10  ;;  %2268 = vmatprep.subr.bf16.mxu1 %v3050_v34 }
 0x49c   : > { %1241 = vmatprep.mubr.f32.mxu0 %v2816_v8  ;;  %1312 = vmatprep.mubr.f32.mxu1 %v2816_v8 }
 0x49e   : > { %2238 = vmatpush1.bf16.msra.mxu0 %v3033_v15  ;;  %2270 = vmatpush1.bf16.msra.mxu1 %v3052_v38 }
 0x49f   : > { %2240 = vmatprep.subr.bf16.mxu0 %v3036_v18  ;;  %2272 = vmatprep.subr.bf16.mxu1 %v3058_v46 }
 0x4a2   : > { %2242 = vmatpush1.bf16.msra.mxu0 %v3043_v27  ;;  %2274 = vmatpush1.bf16.msra.mxu1 %v3064_v49 }
 0x4a3   : > { %2244 = vmatprep.subr.bf16.mxu0 %v3047_v31  ;;  %2276 = vmatprep.subr.bf16.mxu1 %v3067_v53 }
 0x4a6   : > { %2246 = vmatpush1.bf16.msra.mxu0 %v3056_v43  ;;  %2278 = vmatpush1.bf16.msra.mxu1 %v3076_v63 }
 0x4a7   : > { %2248 = vmatprep.subr.bf16.mxu0 %v3061_v47  ;;  %2280 = vmatprep.subr.bf16.mxu1 %v3079_v1 }
 0x4aa   : > { %2250 = vmatpush1.bf16.msra.mxu0 %v3070_v56  ;;  %2282 = vmatpush1.bf16.msra.mxu1 %v3088_v16 }
 0x4ab   : > { %2252 = vmatprep.subr.bf16.mxu0 %v3073_v59  ;;  %2284 = vmatprep.subr.bf16.mxu1 %v3091_v19 }
 0x4ae   : > { %2254 = vmatpush1.bf16.msra.mxu0 %v3082_v7  ;;  %2286 = vmatpush1.bf16.msra.mxu1 %v3100_v32 }
 0x4af   : > { %2256 = vmatprep.subr.bf16.mxu0 %v3085_v11  ;;  %2288 = vmatprep.subr.bf16.mxu1 %v3103_v33 }
 0x4b2   : > { %2258 = vmatpush1.bf16.msra.mxu0 %v3094_v25  ;;  %2290 = vmatpush1.bf16.msra.mxu1 %v3110_v41 }
 0x4b3   : > { %2260 = vmatprep.subr.bf16.mxu0 %v3097_v28  ;;  %2292 = vmatprep.subr.bf16.mxu1 %v3113_v42 }
 0x4b6   : > { %2262 = vmatpush1.bf16.msra.mxu0 %v3106_v40  ;;  %2294 = vmatpush1.bf16.msra.mxu1 %v3117_v50 }
 0x4b7   : > { %2296 = vmatprep.subr.bf16.mxu0 %v3023_v4  ;;  %2328 = vmatprep.subr.bf16.mxu1 %v3038_v23 }
 0x56c   : > { %v1062_v39 = vpop.f32.mrb[8].mxu0  ;;  %v1133_v51 = vpop.f32.mrb[8].mxu1 }
 0x56d   : > { %v1138_v52 = vadd.f32 %v1871_v36, %v1062_v39  ;;  %v1064_v54 = vpop.f32.mrb[9].mxu0  ;;  %v1135_v55 = vpop.f32.mrb[9].mxu1  ;;  %v1140_v3 = vadd.f32 %v1873_v0, %v1133_v51  ;;  %v1880_v36 = vld [vmem:[%s3009_s21 + $0xa8] sm:$0xff] }
 0x56e   : > { %v1139_v57 = vadd.f32 %v1872_v37, %v1064_v54  ;;  %v1141_v62 = vadd.f32 %v1874_v61, %v1135_v55 }
 0x56f   : > { %v1875_v58 = vmul.f32 -1.442695, %v1138_v52 }
 0x570   : > { %v1876_v60 = vmul.f32 -1.442695, %v1139_v57  ;;  %v1877_v2 = vmul.f32 -1.442695, %v1141_v62  ;;  %v1881_v62 = vld [vmem:[%s3009_s21 + $0xb0] sm:$0xff] }
 0x571   : > { %2584 = vpow2.f32 %v1875_v58 }
 0x572   : > { %2586 = vpow2.f32 %v1876_v60  ;;  %v1882_v60 = vld [vmem:[%s3009_s21 + $0xb8] sm:$0xff] }
 0x573   : > { %2588 = vpow2.f32 %v1877_v2 }
 0x574   : > { %2590 = vtanh.f32 %v1140_v3 }
 0x57b   : > { %v2585_v5 = vpop.eup %2584 }
 0x57c   : > { %v2587_v6 = vpop.eup %2586  ;;  %v1145_v12 = vadd.f32 1.0, %v2585_v5 }
 0x57d   : > { %v1151_v13 = vadd.f32 1.0, %v2587_v6  ;;  %v2589_v14 = vpop.eup %2588 }
 0x57e   : > { %2592 = vrcp.f32 %v1145_v12  ;;  %v2591_v17 = vpop.eup %2590  ;;  %v1158_v24 = vadd.f32 1.0, %v2589_v14 }
 0x57f   : > { %2594 = vrcp.f32 %v1151_v13 }
 0x580   : > { %2596 = vrcp.f32 %v1158_v24 }
 0x588   : > { %v2593_v20 = vpop.eup %2592 }
 0x589   : > { %v2595_v21 = vpop.eup %2594  ;;  %v1163_v22 = vmul.f32 %v2593_v20, %v2591_v17 }
 0x58a   : > { %v1162_v29 = vmul.f32 %v2595_v21, %v3290_v35  ;;  %v2597_v44 = vpop.eup %2596  ;;  %v1879_v35 = vld [vmem:[%s3009_s21 + $0xa0] sm:$0xff] }
 0x58c   : > { %v3333_v30 = vadd.f32 %v1163_v22, %v1162_v29 }
 0x58e   : > { %2598 = vtanh.f32 %v3333_v30 }
 0x598   : > { %v2599_v45 = vpop.eup %2598 }
 0x599   : > { %v1166_v48 = vmul.f32 %v2599_v45, %v2597_v44 }
 0x59b   : > { %1878 = vst [vmem:[%s3020_s25 + $0x20] sm:$0xff] %v1166_v48  ;;  %1242 = vmatmul.mubr.f32.vlgmr.msra.gmra.mrb[10].mxu0 %v1166_v48  ;;  %1313 = vmatmul.mubr.f32.vlgmr.msra.gmra.mrb[10].mxu1 %v1166_v48 }
 0x59c   : > { %2298 = vmatpush1.bf16.msra.mxu0 %v3027_v9  ;;  %2330 = vmatpush1.bf16.msra.mxu1 %v3040_v26 }
 0x59d   : > { %2300 = vmatprep.subr.bf16.mxu0 %v3029_v10  ;;  %2332 = vmatprep.subr.bf16.mxu1 %v3050_v34 }
 0x59e   : > { %1422 = vmatprep.mubr.f32.mxu0 %v2816_v8  ;;  %1493 = vmatprep.mubr.f32.mxu1 %v2816_v8 }
 0x5a0   : > { %2302 = vmatpush1.bf16.msra.mxu0 %v3033_v15  ;;  %2334 = vmatpush1.bf16.msra.mxu1 %v3052_v38 }
 0x5a1   : > { %2304 = vmatprep.subr.bf16.mxu0 %v3036_v18  ;;  %2336 = vmatprep.subr.bf16.mxu1 %v3058_v46 }
 0x5a4   : > { %2306 = vmatpush1.bf16.msra.mxu0 %v3043_v27  ;;  %2338 = vmatpush1.bf16.msra.mxu1 %v3064_v49 }
 0x5a5   : > { %2308 = vmatprep.subr.bf16.mxu0 %v3047_v31  ;;  %2340 = vmatprep.subr.bf16.mxu1 %v3067_v53 }
 0x5a8   : > { %2310 = vmatpush1.bf16.msra.mxu0 %v3056_v43  ;;  %2342 = vmatpush1.bf16.msra.mxu1 %v3076_v63 }
 0x5a9   : > { %2312 = vmatprep.subr.bf16.mxu0 %v3061_v47  ;;  %2344 = vmatprep.subr.bf16.mxu1 %v3079_v1 }
 0x5ac   : > { %2314 = vmatpush1.bf16.msra.mxu0 %v3070_v56  ;;  %2346 = vmatpush1.bf16.msra.mxu1 %v3088_v16 }
 0x5ad   : > { %2316 = vmatprep.subr.bf16.mxu0 %v3073_v59  ;;  %2348 = vmatprep.subr.bf16.mxu1 %v3091_v19 }
 0x5b0   : > { %2318 = vmatpush1.bf16.msra.mxu0 %v3082_v7  ;;  %2350 = vmatpush1.bf16.msra.mxu1 %v3100_v32 }
 0x5b1   : > { %2320 = vmatprep.subr.bf16.mxu0 %v3085_v11  ;;  %2352 = vmatprep.subr.bf16.mxu1 %v3103_v33 }
 0x5b4   : > { %2322 = vmatpush1.bf16.msra.mxu0 %v3094_v25  ;;  %2354 = vmatpush1.bf16.msra.mxu1 %v3110_v41 }
 0x5b5   : > { %2324 = vmatprep.subr.bf16.mxu0 %v3097_v28  ;;  %2356 = vmatprep.subr.bf16.mxu1 %v3113_v42 }
 0x5b8   : > { %2326 = vmatpush1.bf16.msra.mxu0 %v3106_v40  ;;  %2358 = vmatpush1.bf16.msra.mxu1 %v3117_v50 }
 0x5b9   : > { %2360 = vmatprep.subr.bf16.mxu0 %v3023_v4  ;;  %2392 = vmatprep.subr.bf16.mxu1 %v3038_v23 }
 0x66e   : > { %v1243_v37 = vpop.f32.mrb[10].mxu0  ;;  %v1314_v39 = vpop.f32.mrb[10].mxu1 }
 0x66f   : > { %v1319_v51 = vadd.f32 %v1879_v35, %v1243_v37  ;;  %v1245_v52 = vpop.f32.mrb[11].mxu0  ;;  %v1316_v54 = vpop.f32.mrb[11].mxu1  ;;  %v1321_v4 = vadd.f32 %v1881_v62, %v1314_v39 }
 0x670   : > { %v1320_v55 = vadd.f32 %v1880_v36, %v1245_v52  ;;  %v1322_v61 = vadd.f32 %v1882_v60, %v1316_v54  ;;  %v1898_v54 = vld [vmem:[%s3009_s21 + $0xf8] sm:$0xff] }
 0x671   : > { %v1883_v57 = vmul.f32 -1.442695, %v1319_v51 }
 0x672   : > { %v1884_v58 = vmul.f32 -1.442695, %v1320_v55  ;;  %v1885_v0 = vmul.f32 -1.442695, %v1322_v61 }
 0x673   : > { %2600 = vpow2.f32 %v1883_v57  ;;  %v1897_v57 = vld [vmem:[%s3009_s21 + $0xf0] sm:$0xff] }
 0x674   : > { %2602 = vpow2.f32 %v1884_v58 }
 0x675   : > { %2604 = vpow2.f32 %v1885_v0 }
 0x676   : > { %2606 = vtanh.f32 %v1321_v4 }
 0x67d   : > { %v2601_v2 = vpop.eup %2600 }
 0x67e   : > { %v2603_v3 = vpop.eup %2602  ;;  %v1326_v23 = vadd.f32 1.0, %v2601_v2 }
 0x67f   : > { %v1332_v5 = vadd.f32 1.0, %v2603_v3  ;;  %v2605_v6 = vpop.eup %2604 }
 0x680   : > { %2608 = vrcp.f32 %v1326_v23  ;;  %v2607_v12 = vpop.eup %2606  ;;  %v1339_v20 = vadd.f32 1.0, %v2605_v6 }
 0x681   : > { %2610 = vrcp.f32 %v1332_v5 }
 0x682   : > { %2612 = vrcp.f32 %v1339_v20 }
 0x68a   : > { %v2609_v13 = vpop.eup %2608 }
 0x68b   : > { %v2611_v14 = vpop.eup %2610  ;;  %v1344_v17 = vmul.f32 %v2609_v13, %v2607_v12 }
 0x68c   : > { %v1343_v21 = vmul.f32 %v2611_v14, %v3333_v30  ;;  %v2613_v24 = vpop.eup %2612  ;;  %v1896_v30 = vld [vmem:[%s3009_s21 + $0xe8] sm:$0xff] }
 0x68e   : > { %v3376_v22 = vadd.f32 %v1344_v17, %v1343_v21 }
 0x690   : > { %2614 = vtanh.f32 %v3376_v22 }
 0x69a   : > { %v2615_v29 = vpop.eup %2614 }
 0x69b   : > { %v1347_v44 = vmul.f32 %v2615_v29, %v2613_v24 }
 0x69d   : > { %1886 = vst [vmem:[%s3020_s25 + $0x28] sm:$0xff] %v1347_v44  ;;  %1423 = vmatmul.mubr.f32.vlgmr.msra.gmra.mrb[12].mxu0 %v1347_v44  ;;  %1494 = vmatmul.mubr.f32.vlgmr.msra.gmra.mrb[12].mxu1 %v1347_v44 }
 0x69e   : > { %2362 = vmatpush1.bf16.msra.mxu0 %v3027_v9  ;;  %2394 = vmatpush1.bf16.msra.mxu1 %v3040_v26  ;;  %v1888_v9 = vld [vmem:[%s3009_s21 + $0xc8] sm:$0xff] }
 0x69f   : > { %2364 = vmatprep.subr.bf16.mxu0 %v3029_v10  ;;  %2396 = vmatprep.subr.bf16.mxu1 %v3050_v34 }
 0x6a0   : > { %1603 = vmatprep.mubr.f32.mxu0 %v2816_v8  ;;  %1674 = vmatprep.mubr.f32.mxu1 %v2816_v8  ;;  %v1887_v8 = vld [vmem:[%s3009_s21 + $0xc0] sm:$0xff] }
 0x6a2   : > { %2366 = vmatpush1.bf16.msra.mxu0 %v3033_v15  ;;  %2398 = vmatpush1.bf16.msra.mxu1 %v3052_v38 }
 0x6a3   : > { %2368 = vmatprep.subr.bf16.mxu0 %v3036_v18  ;;  %2400 = vmatprep.subr.bf16.mxu1 %v3058_v46 }
 0x6a6   : > { %2370 = vmatpush1.bf16.msra.mxu0 %v3043_v27  ;;  %2402 = vmatpush1.bf16.msra.mxu1 %v3064_v49 }
 0x6a7   : > { %2372 = vmatprep.subr.bf16.mxu0 %v3047_v31  ;;  %2404 = vmatprep.subr.bf16.mxu1 %v3067_v53 }
 0x6aa   : > { %2374 = vmatpush1.bf16.msra.mxu0 %v3056_v43  ;;  %2406 = vmatpush1.bf16.msra.mxu1 %v3076_v63  ;;  %v1890_v43 = vld [vmem:[%s3009_s21 + $0xd8] sm:$0xff] }
 0x6ab   : > { %2376 = vmatprep.subr.bf16.mxu0 %v3061_v47  ;;  %2408 = vmatprep.subr.bf16.mxu1 %v3079_v1  ;;  %v1889_v47 = vld [vmem:[%s3009_s21 + $0xd0] sm:$0xff] }
 0x6ae   : > { %2378 = vmatpush1.bf16.msra.mxu0 %v3070_v56  ;;  %2410 = vmatpush1.bf16.msra.mxu1 %v3088_v16 }
 0x6af   : > { %2380 = vmatprep.subr.bf16.mxu0 %v3073_v59  ;;  %2412 = vmatprep.subr.bf16.mxu1 %v3091_v19 }
 0x6b2   : > { %2382 = vmatpush1.bf16.msra.mxu0 %v3082_v7  ;;  %2414 = vmatpush1.bf16.msra.mxu1 %v3100_v32 }
 0x6b3   : > { %2384 = vmatprep.subr.bf16.mxu0 %v3085_v11  ;;  %2416 = vmatprep.subr.bf16.mxu1 %v3103_v33 }
 0x6b6   : > { %2386 = vmatpush1.bf16.msra.mxu0 %v3094_v25  ;;  %2418 = vmatpush1.bf16.msra.mxu1 %v3110_v41 }
 0x6b7   : > { %2388 = vmatprep.subr.bf16.mxu0 %v3097_v28  ;;  %2420 = vmatprep.subr.bf16.mxu1 %v3113_v42 }
 0x6ba   : > { %2390 = vmatpush1.bf16.msra.mxu0 %v3106_v40  ;;  %2422 = vmatpush1.bf16.msra.mxu1 %v3117_v50  ;;  %v1895_v50 = vld [vmem:[%s3009_s21 + $0xe0] sm:$0xff] }
 0x770   : > { %v1424_v10 = vpop.f32.mrb[12].mxu0  ;;  %v1495_v15 = vpop.f32.mrb[12].mxu1 }
 0x771   : > { %v1500_v18 = vadd.f32 %v1887_v8, %v1424_v10  ;;  %v1426_v26 = vpop.f32.mrb[13].mxu0  ;;  %v1497_v27 = vpop.f32.mrb[13].mxu1  ;;  %v1502_v53 = vadd.f32 %v1889_v47, %v1495_v15 }
 0x772   : > { %v1501_v31 = vadd.f32 %v1888_v9, %v1426_v26  ;;  %v1503_v46 = vadd.f32 %v1890_v43, %v1497_v27 }
 0x773   : > { %v1891_v34 = vmul.f32 -1.442695, %v1500_v18 }
 0x774   : > { %v1892_v38 = vmul.f32 -1.442695, %v1501_v31  ;;  %v1893_v49 = vmul.f32 -1.442695, %v1503_v46 }
 0x775   : > { %2616 = vpow2.f32 %v1891_v34 }
 0x776   : > { %2618 = vpow2.f32 %v1892_v38 }
 0x777   : > { %2620 = vpow2.f32 %v1893_v49 }
 0x778   : > { %2622 = vtanh.f32 %v1502_v53 }
 0x77f   : > { %v2617_v56 = vpop.eup %2616 }
 0x780   : > { %v2619_v59 = vpop.eup %2618  ;;  %v1507_v63 = vadd.f32 1.0, %v2617_v56 }
 0x781   : > { %v1513_v1 = vadd.f32 1.0, %v2619_v59  ;;  %v2621_v7 = vpop.eup %2620 }
 0x782   : > { %2624 = vrcp.f32 %v1507_v63  ;;  %v2623_v11 = vpop.eup %2622  ;;  %v1520_v28 = vadd.f32 1.0, %v2621_v7 }
 0x783   : > { %2626 = vrcp.f32 %v1513_v1 }
 0x784   : > { %2628 = vrcp.f32 %v1520_v28 }
 0x78c   : > { %v2625_v16 = vpop.eup %2624 }
 0x78d   : > { %v2627_v19 = vpop.eup %2626  ;;  %v1525_v25 = vmul.f32 %v2625_v16, %v2623_v11 }
 0x78e   : > { %v1524_v32 = vmul.f32 %v2627_v19, %v3376_v22  ;;  %v2629_v40 = vpop.eup %2628 }
 0x790   : > { %v1526_v33 = vadd.f32 %v1525_v25, %v1524_v32 }
 0x792   : > { %2630 = vtanh.f32 %v1526_v33 }
 0x79c   : > { %v2631_v41 = vpop.eup %2630 }
 0x79d   : > { %v1528_v42 = vmul.f32 %v2631_v41, %v2629_v40 }
 0x79f   : > { %1894 = vst [vmem:[%s3020_s25 + $0x30] sm:$0xff] %v1528_v42  ;;  %1604 = vmatmul.mubr.f32.vlgmr.msra.gmra.mrb[14].mxu0 %v1528_v42  ;;  %1675 = vmatmul.mubr.f32.vlgmr.msra.gmra.mrb[14].mxu1 %v1528_v42 }
 0x872   : > { %v1605_v45 = vpop.f32.mrb[14].mxu0  ;;  %v1676_v48 = vpop.f32.mrb[14].mxu1 }
 0x873   : > { %v1681_v35 = vadd.f32 %v1895_v50, %v1605_v45  ;;  %v1607_v36 = vpop.f32.mrb[15].mxu0  ;;  %v1678_v37 = vpop.f32.mrb[15].mxu1  ;;  %v1683_v60 = vadd.f32 %v1897_v57, %v1676_v48 }
 0x874   : > { %v1682_v39 = vadd.f32 %v1896_v30, %v1607_v36  ;;  %v1684_v55 = vadd.f32 %v1898_v54, %v1678_v37 }
 0x875   : > { %v1899_v51 = vmul.f32 -1.442695, %v1681_v35 }
 0x876   : > { %v1900_v52 = vmul.f32 -1.442695, %v1682_v39  ;;  %v1901_v58 = vmul.f32 -1.442695, %v1684_v55 }
 0x877   : > { %2632 = vpow2.f32 %v1899_v51 }
 0x878   : > { %2634 = vpow2.f32 %v1900_v52 }
 0x879   : > { %2636 = vpow2.f32 %v1901_v58 }
 0x87a   : > { %2638 = vtanh.f32 %v1683_v60 }
 0x881   : > { %v2633_v61 = vpop.eup %2632 }
 0x882   : > { %v2635_v62 = vpop.eup %2634  ;;  %v1688_v0 = vadd.f32 1.0, %v2633_v61 }
 0x883   : > { %v1694_v4 = vadd.f32 1.0, %v2635_v62  ;;  %v2637_v2 = vpop.eup %2636 }
 0x884   : > { %2640 = vrcp.f32 %v1688_v0  ;;  %v2639_v3 = vpop.eup %2638  ;;  %v1701_v12 = vadd.f32 1.0, %v2637_v2 }
 0x885   : > { %2642 = vrcp.f32 %v1694_v4 }
 0x886   : > { %2644 = vrcp.f32 %v1701_v12 }
 0x88e   : > { %v2641_v23 = vpop.eup %2640 }
 0x88f   : > { %v2643_v5 = vpop.eup %2642  ;;  %v1706_v6 = vmul.f32 %v2641_v23, %v2639_v3 }
 0x890   : > { %v1705_v13 = vmul.f32 %v2643_v5, %v1526_v33  ;;  %v2645_v17 = vpop.eup %2644 }
 0x892   : > { %v1707_v14 = vadd.f32 %v1706_v6, %v1705_v13 }
 0x894   : > { %2646 = vtanh.f32 %v1707_v14  ;;  %1710 = vst [vmem:[#allocation3] sm:$0xff] %v1707_v14 }
 0x89e   : > { %v2647_v20 = vpop.eup %2646 }
 0x89f   : > { %v1709_v21 = vmul.f32 %v2647_v20, %v2645_v17 }
 0x8a1   : > { %1711 = vst [vmem:[#allocation2] sm:$0xff] %v1709_v21  ;;  %1902 = vst [vmem:[%s3020_s25 + $0x38] sm:$0xff] %v1709_v21 }
 0x8a2   : > { %2719 = shalt.err (!%p2716_p2)
}
 0x8a3   : > { %s2720_s17 = scalar_lea.hbm %s3428_s3, 1024  ;;  %s2724_s19 = scalar_lea.hbm %s3487_s2, 4096 }
 0x8a4   : > { %p2721_p6 = scmp.ne.s32.totalorder %s3428_s3, %s2720_s17  ;;  %p2725_p4 = scmp.lt.u32.totalorder %s3428_s3, %s3487_s2 }
 0x8a5   : > { %p2726_p12 = scmp.lt.u32.totalorder %s2724_s19, %s2720_s17  ;;  %p2728_p13 = scmp.lt.u32.totalorder %s2720_s17, %s3428_s3 }
 0x8a6   : > { %p2722_p10 = pnand %p2721_p6, %p3519_p5 }
 0x8a7   : > { %p2727_p11 = por %p2726_p12, %p2725_p4 }
 0x8a8   : > { %p2723_p1 = pneg %p2722_p10 }
 0x8a9   : > { %p2729_p0 = por %p2728_p13, %p2727_p11 }
 0x8ab   : > { %p2730_p3 = pnand %p2729_p0, %p2723_p1 }
 0x8ad   : > { %2733 = shalt.err (!%p2730_p3)
}
 0x8ae   : > { %s2818_s24 = smov 128   ;;  %s2819_s25 = smov 256  }
 0x8af   : > { %s2820_s20 = smov 8  }
 0x8b0   : > { %2429 = dma.vmem_to_hbm [thread:$0]  (%p3519_p5), %s3430_s26, 1024, %s3428_s3, %s1715_s5, %s2818_s24, %s2819_s25, %s2820_s20  }
 0x8b1 PF: > { %s3520_s22 = sld [smem:[#allocation14_spill]]  ;;  %p2446_p7 = scmp.ge.s32.totalorder %s2808_s16, 2 }
 0x8b2   : > { %s1745_s29 = sand.u32 1, %s2780_s9  }
 0x8b3   : > { %s1746_s6 = scalar_lea.sflag [#allocation6], %s1745_s29 }
 0x8b7   : > { %p3521_p8 = scmp.ne.s32.totalorder %s3520_s22, 0 }
 0x8b9   : > { %p2440_p9 = pnand %p2446_p7, %p3521_p8 }
 0x8bb   : > { %2775 = dma.done.wait (!%p2440_p9), %s1746_s6, 1024  }
 0x8bc   : > { %2777 = vsyncadd (!%p2440_p9), %s1746_s6, 4294966272  ;;  %s19_s16 = sadd.s32 1, %s2808_s16   ;;  %s3522_s12 = sld [smem:[#allocation13_spill]] }
 0x8bd   : > { %p16_p2 = scmp.ge.s32.totalorder %s19_s16, 6   ;;  %s3523_s23 = sld [smem:[#allocation15_spill]] }
 0x8be   : > { %s3524_s9 = smov %s2784_s10  ;;  %s3525_s10 = smov %s2788_s11 }
 0x8bf   : > { %s3526_s11 = smov %s2970_s14  ;;  %s3527_s13 = smov %s2804_s15 }
 0x8c0   : > { %s3529_s15 = smov %s3535_s4  ;;  %18 = sbr.rel (!%p16_p2) target bundleno = 10 (0xa), region = 95 }
 0x8c3   : > { %s3528_s14 = smov %s3523_s23 }
 0x8c7   :  { %1751 = vsyncpa [#allocation5], 1 }
 0x8c8   :  { %1753 = vsyncpa [#allocation5 + $0x1], 1 }
 0x8c9   :  { %1754 = vsyncpa [#allocation8], 1 }
 0x8ca   :  { %1755 = vsyncpa [#allocation6], 1 }
 0x8cb   :  { %1757 = vsyncpa [#allocation6 + $0x1], 1 }

</bundles_post_ra>
